<compile_context>
chip_gen: v7x
topology: tpu7x:2x2x1
jax: 0.10.0
libtpu: 0.0.40
codegen_flags: <defaults>
</compile_context>

<pallas_src>
import functools

import jax
import jax.numpy as jnp
from jax.experimental import pallas as pl
from jax.experimental.pallas import tpu as pltpu

# SELU constants (match torch.nn.SELU), folded form:
#   selu(x) = scale*max(x,0) + (scale*alpha)*exp(min(x,0)) - (scale*alpha)
_SELU_SCALE = 1.0507009873554805
_SELU_SCALE_ALPHA = _SELU_SCALE * 1.6732632423543772


def _selu(x):
    return (_SELU_SCALE * jnp.maximum(x, 0.0)
            + _SELU_SCALE_ALPHA * jnp.exp(jnp.minimum(x, 0.0))
            - _SELU_SCALE_ALPHA)


def _mlp_kernel(xp_ref, w1_ref, b1_ref, w2_ref, b2_ref, w3_ref, b3_ref, op_ref,
                *, act_dtype):
    # Feature-major compute: every activation is (packed_features, cols) with the
    # (packed) batch on the 128-lane axis.  Weights are packed kron(W, I_G) so
    # each dot is a single dense MXU matmul across all G batch groups.
    h = jnp.dot(w1_ref[...], xp_ref[...], preferred_element_type=jnp.float32)
    h = _selu((h + b1_ref[...]).astype(act_dtype)).astype(w2_ref.dtype)
    h = jnp.dot(w2_ref[...], h, preferred_element_type=jnp.float32)
    h = _selu((h + b2_ref[...]).astype(act_dtype)).astype(w3_ref.dtype)
    o = jnp.dot(w3_ref[...], h, preferred_element_type=jnp.float32)
    op_ref[...] = (o + b3_ref[...]).astype(op_ref.dtype)


def _pre_v6_tpu():
    try:
        kind = jax.devices()[0].device_kind.lower()
        return any(v in kind for v in ("v2", "v3", "v4", "v5"))
    except Exception:
        return False


def pytorch_agent_forward(x, params, *, batch_tile=8192, group=None,
                          compute_dtype=jnp.bfloat16):
    """Forward pass of PytorchAgent.

    x: anything reshapeable to (-1, num_inputs).
    params: torch-style weights: w1 (H,in), b1 (H,1), w2 (H,H), b2 (H,1),
            w3 (out,H), b3 (out,1).
    compute_dtype: jnp.bfloat16 (default; MXU-native inputs, f32 accumulate)
            or jnp.float32 for exact validation.
    Returns (batch, num_outputs) float32.
    """
    w1, b1 = params["w1"], params["b1"]
    w2, b2 = params["w2"], params["b2"]
    w3, b3 = params["w3"], params["b3"]
    num_inputs, hidden, num_outputs = w1.shape[1], w1.shape[0], w3.shape[0]

    x32 = jnp.asarray(x, jnp.float32).reshape(-1, num_inputs)   # torch: view(-1, in)
    batch = x32.shape[0]

    pre_v6 = _pre_v6_tpu()
    native_mxu = 128 if pre_v6 else 256
    G = int(group) if group is not None else max(1, native_mxu // max(int(hidden), 1))
    G = max(1, G)
    # v5e's VPU has no bf16; keep SELU in f32 there, bf16 elsewhere (when requested).
    act_dtype = jnp.float32 if pre_v6 else compute_dtype

    # --- tile selection ----------------------------------------------------
    lane = 128
    cols_needed = pl.cdiv(batch, G)                      # packed-batch columns
    max_cols = max(lane, (batch_tile // G) // lane * lane)
    if cols_needed <= max_cols:
        if cols_needed >= 2 * lane:
            # Enough work: keep >= 2 grid steps so both v7x TensorCores get a
            # share and DMA overlaps compute.
            tn = max(lane, cols_needed // (2 * lane) * lane)
        else:
            tn = lane
    else:
        tn = max_cols
    n_steps = pl.cdiv(cols_needed, tn)
    padded_batch = n_steps * tn * G                      # zero-pad the batch

    # --- pack inputs / weights (wrapper-side layout plumbing only) ----------
    xc = x32.astype(compute_dtype)
    if padded_batch != batch:
        xc = jnp.pad(xc, ((0, padded_batch - batch), (0, 0)))
    # (in, B) -> (G*in, B/G): row f*G + g holds feature f of batch group g.
    xP = xc.T.reshape(G * num_inputs, padded_batch // G)

    eye = jnp.eye(G, dtype=jnp.float32)
    pack_w = lambda w: jnp.kron(jnp.asarray(w, jnp.float32), eye).astype(compute_dtype)
    pack_b = lambda b: jnp.repeat(jnp.asarray(b, jnp.float32).reshape(-1, 1), G, axis=0)
    w1p, w2p, w3p = pack_w(w1), pack_w(w2), pack_w(w3)
    b1p, b2p, b3p = pack_b(b1), pack_b(b2), pack_b(b3)

    # Advisory cost estimate (packed shapes) so XLA schedules this call sensibly.
    flops = 2 * padded_batch * G * (num_inputs * hidden + hidden * hidden
                                    + hidden * num_outputs)
    bytes_accessed = int(
        xP.size * xP.dtype.itemsize
        + G * num_outputs * (padded_batch // G) * 4
        + sum(int(a.size) * a.dtype.itemsize
              for a in (w1p, b1p, w2p, b2p, w3p, b3p)))
    cost = pl.CostEstimate(flops=int(flops),
                           transcendentals=int(2 * padded_batch * hidden),
                           bytes_accessed=bytes_accessed)

    # Constant block index -> weights/biases stay VMEM-resident across the grid.
    const = lambda a: pl.BlockSpec(a.shape, lambda i: (0, 0))

    outP = pl.pallas_call(
        functools.partial(_mlp_kernel, act_dtype=act_dtype),
        out_shape=jax.ShapeDtypeStruct((G * num_outputs, padded_batch // G),
                                       jnp.float32),
        grid_spec=pltpu.PrefetchScalarGridSpec(
            num_scalar_prefetch=0,
            grid=(n_steps,),
            in_specs=[
                pl.BlockSpec((G * num_inputs, tn), lambda i: (0, i)),  # x tile (pipelined)
                const(w1p), const(b1p),
                const(w2p), const(b2p),
                const(w3p), const(b3p),
            ],
            out_specs=pl.BlockSpec((G * num_outputs, tn), lambda i: (0, i)),
        ),
        compiler_params=pltpu.CompilerParams(
            dimension_semantics=("parallel",),   # v7x: shard the batch grid across TCs
            vmem_limit_bytes=32 * 1024 * 1024,
        ),
        cost_estimate=cost,
    )(xP, w1p, b1p, w2p, b2p, w3p, b3p)

    # (G*out, B/G) -> (out, B) is a pure reshape in this packed layout; the
    # final (B, out) transpose is the cheap (batch x 16 B) wrapper-side flip.
    out = outP.reshape(num_outputs, padded_batch).T
    return out[:batch] if padded_batch != batch else out


def init_params(key, num_inputs, num_outputs, hidden_size):
    """Deterministic synthetic init (PyTorch Linear-style uniform bounds),
    stored torch-style: W (out, in), b (out, 1)."""
    ks = jax.random.split(key, 6)

    def lin(kw, kb, fan_in, fan_out):
        bound = 1.0 / jnp.sqrt(float(fan_in))
        w = jax.random.uniform(kw, (fan_out, fan_in), jnp.float32, -bound, bound)
        b = jax.random.uniform(kb, (fan_out, 1), jnp.float32, -bound, bound)
        return w, b

    w1, b1 = lin(ks[0], ks[1], num_inputs, hidden_size)
    w2, b2 = lin(ks[2], ks[3], hidden_size, hidden_size)
    w3, b3 = lin(ks[4], ks[5], hidden_size, num_outputs)
    return {"w1": w1, "b1": b1, "w2": w2, "b2": b2, "w3": w3, "b3": b3}


def _ref_forward(x, p):
    h = _selu(x @ p["w1"].T + p["b1"].T)
    h = _selu(h @ p["w2"].T + p["b2"].T)
    return h @ p["w3"].T + p["b3"].T


if __name__ == "__main__":
    # PytorchAgent shapes: inputs viewed as (-1, num_inputs); outputs are
    # [dVx, dVy, dVz, time_to_req] -> 4.
    num_inputs, num_outputs, hidden_size = 8, 4, 32

    key = jax.random.PRNGKey(0)
    k_x, k_x2, k_p = jax.random.split(key, 3)
    params = init_params(k_p, num_inputs, num_outputs, hidden_size)

    # 1) Small batch, f32 compute path: exact check vs pure-JAX reference.
    x = jax.random.normal(k_x, (8, num_inputs), dtype=jnp.float32)
    out = pytorch_agent_forward(x, params, compute_dtype=jnp.float32)
    jax.block_until_ready(out)
    ref = _ref_forward(x, params)
    assert out.shape == (8, num_outputs)
    assert jnp.allclose(out, ref, atol=1e-5, rtol=1e-5)

    # 2) Ragged multi-tile batch, default bf16 MXU path (loosened tolerance).
    x2 = jax.random.normal(k_x2, (2048 + 37, num_inputs), dtype=jnp.float32)
    out2 = pytorch_agent_forward(x2, params)                 # bf16 default
    jax.block_until_ready(out2)
    ref2 = _ref_forward(x2, params)
    assert out2.shape == (2048 + 37, num_outputs)
    assert jnp.allclose(out2, ref2, atol=5e-2, rtol=5e-2)

    # 3) Same ragged batch, f32 path: exact check of padding / tiling / packing.
    out3 = pytorch_agent_forward(x2, params, compute_dtype=jnp.float32)
    jax.block_until_ready(out3)
    assert jnp.allclose(out3, ref2, atol=1e-4, rtol=1e-4)

    # TODO(synk): get_action's numpy post-processing (divide by mean(action),
    # NaN sentinel in the last slot) is host-side glue outside the nn.Module
    # forward and is not a kernel op.
    print("KERNEL_OK")
</pallas_src>

<mosaic_0001>
module attributes {stable_mosaic.version = 11 : i64} {
  func.func @_mlp_kernel(%arg0: i32, %arg1: memref<64x128xf32, #tpu.memory_space<vmem>>, %arg2: memref<256x64xf32, #tpu.memory_space<vmem>>, %arg3: memref<256x1xf32, #tpu.memory_space<vmem>>, %arg4: memref<256x256xf32, #tpu.memory_space<vmem>>, %arg5: memref<256x1xf32, #tpu.memory_space<vmem>>, %arg6: memref<32x256xf32, #tpu.memory_space<vmem>>, %arg7: memref<32x1xf32, #tpu.memory_space<vmem>>, %arg8: memref<32x128xf32, #tpu.memory_space<vmem>>) attributes {dimension_semantics = [#tpu.dimension_semantics<parallel>], iteration_bounds = array<i64: 1>, scalar_prefetch = 0 : i64, scratch_operands = 0 : i64, tpu.core_type = #tpu.core_type<tc>, window_params = [{transform_indices = @transform_0, window_bounds = array<i64: 64, 128>}, {pipeline_mode = #tpu.pipeline_mode<synchronous>, transform_indices = @transform_1, window_bounds = array<i64: 256, 64>}, {pipeline_mode = #tpu.pipeline_mode<synchronous>, transform_indices = @transform_2, window_bounds = array<i64: 256, 1>}, {pipeline_mode = #tpu.pipeline_mode<synchronous>, transform_indices = @transform_3, window_bounds = array<i64: 256, 256>}, {pipeline_mode = #tpu.pipeline_mode<synchronous>, transform_indices = @transform_4, window_bounds = array<i64: 256, 1>}, {pipeline_mode = #tpu.pipeline_mode<synchronous>, transform_indices = @transform_5, window_bounds = array<i64: 32, 256>}, {pipeline_mode = #tpu.pipeline_mode<synchronous>, transform_indices = @transform_6, window_bounds = array<i64: 32, 1>}, {transform_indices = @transform_7, window_bounds = array<i64: 32, 128>}]} {
    %c0 = arith.constant 0 : index
    %c0_0 = arith.constant 0 : index
    %0 = vector.load %arg2[%c0, %c0_0] : memref<256x64xf32, #tpu.memory_space<vmem>>, vector<256x64xf32>
    %c0_1 = arith.constant 0 : index
    %c0_2 = arith.constant 0 : index
    %1 = vector.load %arg1[%c0_1, %c0_2] : memref<64x128xf32, #tpu.memory_space<vmem>>, vector<64x128xf32>
    %cst = arith.constant dense<0.000000e+00> : vector<256x128xf32>
    %2 = tpu.matmul %0, %1, %cst {dimension_numbers = #tpu.dot_dimension_numbers<[1], [0], [0], [1], [0, 0, 1, 1], [], []>} : vector<256x64xf32>, vector<64x128xf32>, vector<256x128xf32> -> vector<256x128xf32>
    %c0_3 = arith.constant 0 : index
    %c0_4 = arith.constant 0 : index
    %3 = vector.load %arg3[%c0_3, %c0_4] : memref<256x1xf32, #tpu.memory_space<vmem>>, vector<256x1xf32>
    %4 = vector.broadcast %3 : vector<256x1xf32> to vector<256x128xf32>
    %5 = arith.addf %2, %4 : vector<256x128xf32>
    %cst_5 = arith.constant 0.000000e+00 : f32
    %6 = vector.broadcast %cst_5 : f32 to vector<256x128xf32>
    %7 = arith.maximumf %5, %6 : vector<256x128xf32>
    %cst_6 = arith.constant 1.05070102 : f32
    %8 = vector.broadcast %cst_6 : f32 to vector<256x128xf32>
    %9 = arith.mulf %8, %7 : vector<256x128xf32>
    %cst_7 = arith.constant 0.000000e+00 : f32
    %10 = vector.broadcast %cst_7 : f32 to vector<256x128xf32>
    %11 = arith.minimumf %5, %10 : vector<256x128xf32>
    %12 = math.exp %11 : vector<256x128xf32>
    %cst_8 = arith.constant 1.75809932 : f32
    %13 = vector.broadcast %cst_8 : f32 to vector<256x128xf32>
    %14 = arith.mulf %13, %12 : vector<256x128xf32>
    %15 = arith.addf %9, %14 : vector<256x128xf32>
    %cst_9 = arith.constant 1.75809932 : f32
    %16 = vector.broadcast %cst_9 : f32 to vector<256x128xf32>
    %17 = arith.subf %15, %16 : vector<256x128xf32>
    %c0_10 = arith.constant 0 : index
    %c0_11 = arith.constant 0 : index
    %18 = vector.load %arg4[%c0_10, %c0_11] : memref<256x256xf32, #tpu.memory_space<vmem>>, vector<256x256xf32>
    %cst_12 = arith.constant dense<0.000000e+00> : vector<256x128xf32>
    %19 = tpu.matmul %18, %17, %cst_12 {dimension_numbers = #tpu.dot_dimension_numbers<[1], [0], [0], [1], [0, 0, 1, 1], [], []>} : vector<256x256xf32>, vector<256x128xf32>, vector<256x128xf32> -> vector<256x128xf32>
    %c0_13 = arith.constant 0 : index
    %c0_14 = arith.constant 0 : index
    %20 = vector.load %arg5[%c0_13, %c0_14] : memref<256x1xf32, #tpu.memory_space<vmem>>, vector<256x1xf32>
    %21 = vector.broadcast %20 : vector<256x1xf32> to vector<256x128xf32>
    %22 = arith.addf %19, %21 : vector<256x128xf32>
    %cst_15 = arith.constant 0.000000e+00 : f32
    %23 = vector.broadcast %cst_15 : f32 to vector<256x128xf32>
    %24 = arith.maximumf %22, %23 : vector<256x128xf32>
    %cst_16 = arith.constant 1.05070102 : f32
    %25 = vector.broadcast %cst_16 : f32 to vector<256x128xf32>
    %26 = arith.mulf %25, %24 : vector<256x128xf32>
    %cst_17 = arith.constant 0.000000e+00 : f32
    %27 = vector.broadcast %cst_17 : f32 to vector<256x128xf32>
    %28 = arith.minimumf %22, %27 : vector<256x128xf32>
    %29 = math.exp %28 : vector<256x128xf32>
    %cst_18 = arith.constant 1.75809932 : f32
    %30 = vector.broadcast %cst_18 : f32 to vector<256x128xf32>
    %31 = arith.mulf %30, %29 : vector<256x128xf32>
    %32 = arith.addf %26, %31 : vector<256x128xf32>
    %cst_19 = arith.constant 1.75809932 : f32
    %33 = vector.broadcast %cst_19 : f32 to vector<256x128xf32>
    %34 = arith.subf %32, %33 : vector<256x128xf32>
    %c0_20 = arith.constant 0 : index
    %c0_21 = arith.constant 0 : index
    %35 = vector.load %arg6[%c0_20, %c0_21] : memref<32x256xf32, #tpu.memory_space<vmem>>, vector<32x256xf32>
    %cst_22 = arith.constant dense<0.000000e+00> : vector<32x128xf32>
    %36 = tpu.matmul %35, %34, %cst_22 {dimension_numbers = #tpu.dot_dimension_numbers<[1], [0], [0], [1], [0, 0, 1, 1], [], []>} : vector<32x256xf32>, vector<256x128xf32>, vector<32x128xf32> -> vector<32x128xf32>
    %c0_23 = arith.constant 0 : index
    %c0_24 = arith.constant 0 : index
    %37 = vector.load %arg7[%c0_23, %c0_24] : memref<32x1xf32, #tpu.memory_space<vmem>>, vector<32x1xf32>
    %38 = vector.broadcast %37 : vector<32x1xf32> to vector<32x128xf32>
    %39 = arith.addf %36, %38 : vector<32x128xf32>
    %c0_25 = arith.constant 0 : index
    %c0_26 = arith.constant 0 : index
    %40 = vector.load %arg8[%c0_25, %c0_26] : memref<32x128xf32, #tpu.memory_space<vmem>>, vector<32x128xf32>
    tpu.vector_store %arg8[%c0_25, %c0_26], %39 {strides = array<i32>} : memref<32x128xf32, #tpu.memory_space<vmem>>, vector<32x128xf32>,
    return
  }
  func.func @transform_0(%arg0: i32) -> (i32, i32) {
    %c0_i32 = arith.constant 0 : i32
    %c0_i32_0 = arith.constant 0 : i32
    return %c0_i32, %arg0 : i32, i32
  }
  func.func @transform_1(%arg0: i32) -> (i32, i32) {
    %c0_i32 = arith.constant 0 : i32
    %c0_i32_0 = arith.constant 0 : i32
    %c0_i32_1 = arith.constant 0 : i32
    return %c0_i32, %c0_i32_0 : i32, i32
  }
  func.func @transform_2(%arg0: i32) -> (i32, i32) {
    %c0_i32 = arith.constant 0 : i32
    %c0_i32_0 = arith.constant 0 : i32
    %c0_i32_1 = arith.constant 0 : i32
    return %c0_i32, %c0_i32_0 : i32, i32
  }
  func.func @transform_3(%arg0: i32) -> (i32, i32) {
    %c0_i32 = arith.constant 0 : i32
    %c0_i32_0 = arith.constant 0 : i32
    %c0_i32_1 = arith.constant 0 : i32
    return %c0_i32, %c0_i32_0 : i32, i32
  }
  func.func @transform_4(%arg0: i32) -> (i32, i32) {
    %c0_i32 = arith.constant 0 : i32
    %c0_i32_0 = arith.constant 0 : i32
    %c0_i32_1 = arith.constant 0 : i32
    return %c0_i32, %c0_i32_0 : i32, i32
  }
  func.func @transform_5(%arg0: i32) -> (i32, i32) {
    %c0_i32 = arith.constant 0 : i32
    %c0_i32_0 = arith.constant 0 : i32
    %c0_i32_1 = arith.constant 0 : i32
    return %c0_i32, %c0_i32_0 : i32, i32
  }
  func.func @transform_6(%arg0: i32) -> (i32, i32) {
    %c0_i32 = arith.constant 0 : i32
    %c0_i32_0 = arith.constant 0 : i32
    %c0_i32_1 = arith.constant 0 : i32
    return %c0_i32, %c0_i32_0 : i32, i32
  }
  func.func @transform_7(%arg0: i32) -> (i32, i32) {
    %c0_i32 = arith.constant 0 : i32
    %c0_i32_0 = arith.constant 0 : i32
    return %c0_i32, %arg0 : i32, i32
  }
}

</mosaic_0001>

<bundles_post_ra>
// kernel: tpu_custom_call.1
= control target key start
LH: loop header
LB: loop body
LE: loop exit
PB: predicated region body
PF: predicated region fallthrough
CT: control target
= control target key end

     0   :  { %v2242_v3 = vmov 0   ;;  %vm259_vm0 = vcmask 523264   ;;  %s3198_s0 = inlined_call_operand.vmem [shape: f32[64,128], index: 0, kind: input, shape index: {}]   ;;  %s3199_s1 = inlined_call_operand.vmem [shape: f32[256,64], index: 1, kind: input, shape index: {}]   ;;  %s3200_s2 = inlined_call_operand.vmem [shape: f32[256,1], index: 2, kind: input, shape index: {}]   ;;  %s3201_s3 = inlined_call_operand.vmem [shape: f32[256,256], index: 3, kind: input, shape index: {}]   ;;  %s3202_s4 = inlined_call_operand.vmem [shape: f32[256,1], index: 4, kind: input, shape index: {}]   ;;  %s3203_s5 = inlined_call_operand.vmem [shape: f32[32,256], index: 5, kind: input, shape index: {}]   ;;  %s3204_s6 = inlined_call_operand.vmem [shape: f32[32,1], index: 6, kind: input, shape index: {}]   ;;  %s3205_s7 = inlined_call_operand.hbm [shape: f32[32,128], index: 7, kind: output, shape index: {}]  }
   0x1   :  { %v69_v0 = vld [vmem:[%s3200_s2 + $0x10] sm:$0xff]  ;;  %v67_v1 = vld [vmem:[%s3200_s2] sm:$0xff]  ;;  %2089 = vset.pattern.permute.xlu1 %v2242_v3  ;;  %2088 = vset.pattern.permute.xlu0 %v2242_v3  ;;  %v60_v4 = vld [vmem:[%s3198_s0 + $0x8] sm:$0xff] }
   0x2   :  { %v59_v2 = vld [vmem:[%s3198_s0] sm:$0xff]  ;;  %111 = vperm.xlu1 %2089, %v69_v0   ;;  %101 = vperm.xlu0 %2088, %v67_v1   ;;  %v61_v6 = vld [vmem:[%s3198_s0 + $0x10] sm:$0xff]  ;;  %v62_v7 = vld [vmem:[%s3198_s0 + $0x18] sm:$0xff] }
   0x3   :  { %v1955_v5 = vpack.c.bf16 %v60_v4, %v59_v2  ;;  %v70_v8 = vld [vmem:[%s3200_s2 + $0x18] sm:$0xff]  ;;  %v68_v9 = vld [vmem:[%s3200_s2 + $0x8] sm:$0xff]  ;;  %v1959_v10 = vpack.c.bf16 %v62_v7, %v61_v6  ;;  %v63_v11 = vld [vmem:[%s3198_s0 + $0x20] sm:$0xff] }
   0x4   :  { %v64_v12 = vld [vmem:[%s3198_s0 + $0x28] sm:$0xff]  ;;  %v27_v13 = vld [vmem:[%s3199_s1] sm:$0xff]  ;;  %v65_v17 = vld [vmem:[%s3198_s0 + $0x30] sm:$0xff] }
   0x5   :  { %1956 = vmatprep.subr.bf16.mxu0 %v1955_v5  ;;  %v72_v14 = vld [vmem:[%s3200_s2 + $0x28] sm:$0xff]  ;;  %v71_v15 = vld [vmem:[%s3200_s2 + $0x20] sm:$0xff]  ;;  %v1963_v16 = vpack.c.bf16 %v64_v12, %v63_v11  ;;  %1907 = vmatprep.mubr.msk.f32.mxu0 %vm259_vm0, %v27_v13  ;;  %v66_v18 = vld [vmem:[%s3198_s0 + $0x38] sm:$0xff] }
   0x6   :  { %1958 = vmatpush3.bf16.msra.mxu0 %v1955_v5  ;;  %116 = vperm.xlu1 %2089, %v70_v8   ;;  %v74_v19 = vld [vmem:[%s3200_s2 + $0x38] sm:$0xff]  ;;  %v73_v20 = vld [vmem:[%s3200_s2 + $0x30] sm:$0xff]  ;;  %v1967_v21 = vpack.c.bf16 %v66_v18, %v65_v17  ;;  %v76_v22 = vld [vmem:[%s3200_s2 + $0x48] sm:$0xff] }
   0x7   :  { %106 = vperm.xlu0 %2088, %v68_v9   ;;  %1960 = vmatprep.subr.bf16.mxu0 %v1959_v10  ;;  %v75_v23 = vld [vmem:[%s3200_s2 + $0x40] sm:$0xff]  ;;  %v28_v24 = vld [vmem:[%s3199_s1 + $0x8] sm:$0xff]  ;;  %v29_v25 = vld [vmem:[%s3199_s1 + $0x10] sm:$0xff] }
   0x8   :  { %v78_v26 = vld [vmem:[%s3200_s2 + $0x58] sm:$0xff]  ;;  %v77_v27 = vld [vmem:[%s3200_s2 + $0x50] sm:$0xff]  ;;  %v31_v29 = vld [vmem:[%s3199_s1 + $0x20] sm:$0xff] }
   0x9   :  { %v30_v28 = vld [vmem:[%s3199_s1 + $0x18] sm:$0xff]  ;;  %v80_v30 = vld [vmem:[%s3200_s2 + $0x68] sm:$0xff]  ;;  %v79_v31 = vld [vmem:[%s3200_s2 + $0x60] sm:$0xff] }
   0xa   :  { %1962 = vmatpush3.bf16.msra.mxu0 %v1959_v10  ;;  %126 = vperm.xlu1 %2089, %v72_v14   ;;  %v32_v32 = vld [vmem:[%s3199_s1 + $0x28] sm:$0xff]  ;;  %v33_v33 = vld [vmem:[%s3199_s1 + $0x30] sm:$0xff]  ;;  %v82_v34 = vld [vmem:[%s3200_s2 + $0x78] sm:$0xff] }
   0xb   :  { %121 = vperm.xlu0 %2088, %v71_v15   ;;  %1964 = vmatprep.subr.bf16.mxu0 %v1963_v16  ;;  %v81_v35 = vld [vmem:[%s3200_s2 + $0x70] sm:$0xff]  ;;  %v34_v36 = vld [vmem:[%s3199_s1 + $0x38] sm:$0xff]  ;;  %v35_v37 = vld [vmem:[%s3199_s1 + $0x40] sm:$0xff] }
   0xc   :  { %v84_v38 = vld [vmem:[%s3200_s2 + $0x88] sm:$0xff]  ;;  %v83_v39 = vld [vmem:[%s3200_s2 + $0x80] sm:$0xff]  ;;  %v37_v41 = vld [vmem:[%s3199_s1 + $0x50] sm:$0xff] }
   0xd   :  { %v36_v40 = vld [vmem:[%s3199_s1 + $0x48] sm:$0xff]  ;;  %v86_v42 = vld [vmem:[%s3200_s2 + $0x98] sm:$0xff]  ;;  %v85_v43 = vld [vmem:[%s3200_s2 + $0x90] sm:$0xff] }
   0xe   :  { %1966 = vmatpush3.bf16.msra.mxu0 %v1963_v16  ;;  %136 = vperm.xlu1 %2089, %v74_v19  }
   0xf   :  { %131 = vperm.xlu0 %2088, %v73_v20   ;;  %1968 = vmatprep.subr.bf16.mxu0 %v1967_v21 }
  0x12   :  { %1970 = vmatpush3.bf16.msra.mxu0 %v1967_v21  ;;  %146 = vperm.xlu1 %2089, %v76_v22  }
  0x13   :  { %141 = vperm.xlu0 %2088, %v75_v23  }
  0x15   :  { %1908 = vmatmul.mubr.msk.f32.vlgmr.msra.gmra.mrb[0].mxu0 %vm259_vm0, %v28_v24 }
  0x16   :  { %1910 = vmatprep.mubr.msk.f32.mxu0 %vm259_vm0, %v29_v25  ;;  %156 = vperm.xlu1 %2089, %v78_v26  }
  0x17   :  { %151 = vperm.xlu0 %2088, %v77_v27  }
  0x19   :  { %1911 = vmatmul.mubr.msk.f32.gmra.mrb[2].mxu0 %vm259_vm0, %v30_v28 }
  0x1a   :  { %1913 = vmatprep.mubr.msk.f32.mxu0 %vm259_vm0, %v31_v29  ;;  %166 = vperm.xlu1 %2089, %v80_v30  }
  0x1b   :  { %161 = vperm.xlu0 %2088, %v79_v31  }
  0x1d   :  { %1914 = vmatmul.mubr.msk.f32.gmra.mrb[4].mxu0 %vm259_vm0, %v32_v32 }
  0x1e   :  { %1916 = vmatprep.mubr.msk.f32.mxu0 %vm259_vm0, %v33_v33  ;;  %176 = vperm.xlu1 %2089, %v82_v34  }
  0x1f   :  { %171 = vperm.xlu0 %2088, %v81_v35  }
  0x21   :  { %1917 = vmatmul.mubr.msk.f32.gmra.mrb[6].mxu0 %vm259_vm0, %v34_v36 }
  0x22   :  { %1919 = vmatprep.mubr.msk.f32.mxu0 %vm259_vm0, %v35_v37  ;;  %186 = vperm.xlu1 %2089, %v84_v38  }
  0x23   :  { %181 = vperm.xlu0 %2088, %v83_v39  }
  0x25   :  { %1920 = vmatmul.mubr.msk.f32.gmra.mrb[8].mxu0 %vm259_vm0, %v36_v40 }
  0x26   :  { %12 = vsyncpa [#allocation3], 0  ;;  %1922 = vmatprep.mubr.msk.f32.mxu0 %vm259_vm0, %v37_v41  ;;  %v38_v44 = vld [vmem:[%s3199_s1 + $0x58] sm:$0xff]  ;;  %196 = vperm.xlu1 %2089, %v86_v42   ;;  %v39_v45 = vld [vmem:[%s3199_s1 + $0x60] sm:$0xff] }
  0x27   :  { %191 = vperm.xlu0 %2088, %v85_v43   ;;  %v88_v46 = vld [vmem:[%s3200_s2 + $0xa8] sm:$0xff]  ;;  %v87_v47 = vld [vmem:[%s3200_s2 + $0xa0] sm:$0xff]  ;;  %v41_v49 = vld [vmem:[%s3199_s1 + $0x70] sm:$0xff] }
  0x28   :  { %v40_v48 = vld [vmem:[%s3199_s1 + $0x68] sm:$0xff]  ;;  %v90_v50 = vld [vmem:[%s3200_s2 + $0xb8] sm:$0xff]  ;;  %v89_v51 = vld [vmem:[%s3200_s2 + $0xb0] sm:$0xff] }
  0x29   :  { %1923 = vmatmul.mubr.msk.f32.gmra.mrb[10].mxu0 %vm259_vm0, %v38_v44  ;;  %v42_v52 = vld [vmem:[%s3199_s1 + $0x78] sm:$0xff]  ;;  %v43_v53 = vld [vmem:[%s3199_s1 + $0x80] sm:$0xff]  ;;  %v92_v54 = vld [vmem:[%s3200_s2 + $0xc8] sm:$0xff] }
  0x2a   :  { %1925 = vmatprep.mubr.msk.f32.mxu0 %vm259_vm0, %v39_v45  ;;  %206 = vperm.xlu1 %2089, %v88_v46   ;;  %v91_v55 = vld [vmem:[%s3200_s2 + $0xc0] sm:$0xff]  ;;  %v44_v56 = vld [vmem:[%s3199_s1 + $0x88] sm:$0xff]  ;;  %v45_v57 = vld [vmem:[%s3199_s1 + $0x90] sm:$0xff] }
  0x2b   :  { %201 = vperm.xlu0 %2088, %v87_v47   ;;  %v94_v58 = vld [vmem:[%s3200_s2 + $0xd8] sm:$0xff]  ;;  %v93_v59 = vld [vmem:[%s3200_s2 + $0xd0] sm:$0xff]  ;;  %v47_v61 = vld [vmem:[%s3199_s1 + $0xa0] sm:$0xff] }
  0x2c   :  { %v46_v60 = vld [vmem:[%s3199_s1 + $0x98] sm:$0xff]  ;;  %v96_v62 = vld [vmem:[%s3200_s2 + $0xe8] sm:$0xff]  ;;  %v95_v63 = vld [vmem:[%s3200_s2 + $0xe0] sm:$0xff] }
  0x2d   :  { %1926 = vmatmul.mubr.msk.f32.gmra.mrb[12].mxu0 %vm259_vm0, %v40_v48  ;;  %v48_v0 = vld [vmem:[%s3199_s1 + $0xa8] sm:$0xff]  ;;  %v49_v1 = vld [vmem:[%s3199_s1 + $0xb0] sm:$0xff]  ;;  %v98_v2 = vld [vmem:[%s3200_s2 + $0xf8] sm:$0xff] }
  0x2e   :  { %1928 = vmatprep.mubr.msk.f32.mxu0 %vm259_vm0, %v41_v49  ;;  %216 = vperm.xlu1 %2089, %v90_v50   ;;  %v97_v3 = vld [vmem:[%s3200_s2 + $0xf0] sm:$0xff]  ;;  %v50_v4 = vld [vmem:[%s3199_s1 + $0xb8] sm:$0xff]  ;;  %v51_v5 = vld [vmem:[%s3199_s1 + $0xc0] sm:$0xff]  ;;  %v2243_v49 = vmov 0.0|0.0  }
  0x2f   :  { %211 = vperm.xlu0 %2088, %v89_v51   ;;  %v918_v6 = vld [vmem:[%s3202_s4 + $0x88] sm:$0xff]  ;;  %v917_v7 = vld [vmem:[%s3202_s4 + $0x80] sm:$0xff]  ;;  %v53_v9 = vld [vmem:[%s3199_s1 + $0xd0] sm:$0xff]  ;;  %1971 = vmatprep.subr.bf16.mxu0 %v2243_v49 }
  0x30   :  { %v52_v8 = vld [vmem:[%s3199_s1 + $0xc8] sm:$0xff]  ;;  %v901_v11 = vld [vmem:[%s3202_s4] sm:$0xff]  ;;  %v54_v12 = vld [vmem:[%s3199_s1 + $0xd8] sm:$0xff]  ;;  %2051 = vmatprep.subr.bf16.mxu1 %v2243_v49 }
  0x31   :  { %1929 = vmatmul.mubr.msk.f32.gmra.mrb[14].mxu0 %vm259_vm0, %v42_v52  ;;  %v902_v10 = vld [vmem:[%s3202_s4 + $0x8] sm:$0xff]  ;;  %v55_v13 = vld [vmem:[%s3199_s1 + $0xe0] sm:$0xff]  ;;  %v920_v14 = vld [vmem:[%s3202_s4 + $0x98] sm:$0xff] }
  0x32   :  { %1931 = vmatprep.mubr.msk.f32.mxu0 %vm259_vm0, %v43_v53  ;;  %226 = vperm.xlu1 %2089, %v92_v54   ;;  %v919_v15 = vld [vmem:[%s3202_s4 + $0x90] sm:$0xff]  ;;  %v56_v16 = vld [vmem:[%s3199_s1 + $0xe8] sm:$0xff]  ;;  %v904_v18 = vld [vmem:[%s3202_s4 + $0x18] sm:$0xff] }
  0x33   :  { %221 = vperm.xlu0 %2088, %v91_v55   ;;  %v57_v17 = vld [vmem:[%s3199_s1 + $0xf0] sm:$0xff]  ;;  %v58_v20 = vld [vmem:[%s3199_s1 + $0xf8] sm:$0xff]  ;;  %v922_v21 = vld [vmem:[%s3202_s4 + $0xa8] sm:$0xff] }
  0x34   :  { %v903_v19 = vld [vmem:[%s3202_s4 + $0x10] sm:$0xff]  ;;  %v921_v22 = vld [vmem:[%s3202_s4 + $0xa0] sm:$0xff]  ;;  %v906_v23 = vld [vmem:[%s3202_s4 + $0x28] sm:$0xff] }
  0x35   :  { %1932 = vmatmul.mubr.msk.f32.gmra.mrb[16].mxu0 %vm259_vm0, %v44_v56  ;;  %v905_v24 = vld [vmem:[%s3202_s4 + $0x20] sm:$0xff]  ;;  %v924_v25 = vld [vmem:[%s3202_s4 + $0xb8] sm:$0xff]  ;;  %v923_v26 = vld [vmem:[%s3202_s4 + $0xb0] sm:$0xff] }
  0x36   :  { %1934 = vmatprep.mubr.msk.f32.mxu0 %vm259_vm0, %v45_v57  ;;  %236 = vperm.xlu1 %2089, %v94_v58   ;;  %v908_v27 = vld [vmem:[%s3202_s4 + $0x38] sm:$0xff]  ;;  %v907_v28 = vld [vmem:[%s3202_s4 + $0x30] sm:$0xff]  ;;  %v926_v29 = vld [vmem:[%s3202_s4 + $0xc8] sm:$0xff] }
  0x37   :  { %231 = vperm.xlu0 %2088, %v93_v59   ;;  %v925_v30 = vld [vmem:[%s3202_s4 + $0xc0] sm:$0xff]  ;;  %v910_v31 = vld [vmem:[%s3202_s4 + $0x48] sm:$0xff]  ;;  %v928_v33 = vld [vmem:[%s3202_s4 + $0xd8] sm:$0xff] }
  0x38   :  { %v909_v32 = vld [vmem:[%s3202_s4 + $0x40] sm:$0xff]  ;;  %v927_v34 = vld [vmem:[%s3202_s4 + $0xd0] sm:$0xff]  ;;  %v912_v35 = vld [vmem:[%s3202_s4 + $0x58] sm:$0xff] }
  0x39   :  { %1935 = vmatmul.mubr.msk.f32.gmra.mrb[18].mxu0 %vm259_vm0, %v46_v60  ;;  %v911_v36 = vld [vmem:[%s3202_s4 + $0x50] sm:$0xff]  ;;  %v930_v37 = vld [vmem:[%s3202_s4 + $0xe8] sm:$0xff]  ;;  %v929_v38 = vld [vmem:[%s3202_s4 + $0xe0] sm:$0xff] }
  0x3a   :  { %1937 = vmatprep.mubr.msk.f32.mxu0 %vm259_vm0, %v47_v61  ;;  %246 = vperm.xlu1 %2089, %v96_v62   ;;  %v914_v39 = vld [vmem:[%s3202_s4 + $0x68] sm:$0xff]  ;;  %v913_v40 = vld [vmem:[%s3202_s4 + $0x60] sm:$0xff]  ;;  %v932_v41 = vld [vmem:[%s3202_s4 + $0xf8] sm:$0xff] }
  0x3b   :  { %241 = vperm.xlu0 %2088, %v95_v63   ;;  %v931_v42 = vld [vmem:[%s3202_s4 + $0xf0] sm:$0xff]  ;;  %v916_v43 = vld [vmem:[%s3202_s4 + $0x78] sm:$0xff]  ;;  %v1583_v45 = vld [vmem:[%s3204_s6 + $0x8] sm:$0xff] }
  0x3c   :  { %v915_v44 = vld [vmem:[%s3202_s4 + $0x70] sm:$0xff]  ;;  %v1582_v46 = vld [vmem:[%s3204_s6] sm:$0xff]  ;;  %v1585_v47 = vld [vmem:[%s3204_s6 + $0x18] sm:$0xff] }
  0x3d   :  { %1938 = vmatmul.mubr.msk.f32.gmra.mrb[20].mxu0 %vm259_vm0, %v48_v0  ;;  %v1584_v48 = vld [vmem:[%s3204_s6 + $0x10] sm:$0xff]  ;;  %v838_v50 = vld [vmem:[%s3201_s3 + $0x8] sm:$0xff] }
  0x3e   :  { %1940 = vmatprep.mubr.msk.f32.mxu0 %vm259_vm0, %v49_v1  ;;  %256 = vperm.xlu1 %2089, %v98_v2   ;;  %v862_v51 = vld [vmem:[%s3201_s3 + $0xc8] sm:$0xff] }
  0x3f   :  { %251 = vperm.xlu0 %2088, %v97_v3   ;;  %1217 = vmatprep.mubr.f32.mxu1 %v862_v51 }
  0x41   :  { %1941 = vmatmul.mubr.msk.f32.gmra.mrb[22].mxu0 %vm259_vm0, %v50_v4 }
  0x42   :  { %1943 = vmatprep.mubr.msk.f32.mxu0 %vm259_vm0, %v51_v5  ;;  %1020 = vperm.xlu1 %2089, %v918_v6  }
  0x43   :  { %1015 = vperm.xlu0 %2088, %v917_v7  }
  0x45   :  { %1944 = vmatmul.mubr.msk.f32.gmra.mrb[24].mxu0 %vm259_vm0, %v52_v8 }
  0x46   :  { %1946 = vmatprep.mubr.msk.f32.mxu0 %vm259_vm0, %v53_v9  ;;  %940 = vperm.xlu1 %2089, %v902_v10  }
  0x47   :  { %935 = vperm.xlu0 %2088, %v901_v11  }
  0x49   :  { %1947 = vmatmul.mubr.msk.f32.gmra.mrb[26].mxu0 %vm259_vm0, %v54_v12 }
  0x4a   :  { %1949 = vmatprep.mubr.msk.f32.mxu0 %vm259_vm0, %v55_v13  ;;  %1030 = vperm.xlu1 %2089, %v920_v14  }
  0x4b   :  { %1025 = vperm.xlu0 %2088, %v919_v15  }
  0x4d   :  { %1950 = vmatmul.mubr.msk.f32.gmra.mrb[28].mxu0 %vm259_vm0, %v56_v16 }
  0x4e   :  { %1952 = vmatprep.mubr.msk.f32.mxu0 %vm259_vm0, %v57_v17  ;;  %950 = vperm.xlu1 %2089, %v904_v18  }
  0x4f   :  { %945 = vperm.xlu0 %2088, %v903_v19  }
  0x51   :  { %1953 = vmatmul.mubr.msk.f32.gmra.mrb[30].mxu0 %vm259_vm0, %v58_v20 }
  0x52   :  { %1040 = vperm.xlu1 %2089, %v922_v21   ;;  %1157 = vmatprep.mubr.f32.mxu0 %v838_v50 }
  0x53   :  { %1035 = vperm.xlu0 %2088, %v921_v22  }
  0x56   :  { %960 = vperm.xlu1 %2089, %v906_v23  }
  0x57   :  { %955 = vperm.xlu0 %2088, %v905_v24  }
  0x5a   :  { %1050 = vperm.xlu1 %2089, %v924_v25  }
  0x5b   :  { %1045 = vperm.xlu0 %2088, %v923_v26  }
  0x5e   :  { %970 = vperm.xlu1 %2089, %v908_v27  }
  0x5f   :  { %965 = vperm.xlu0 %2088, %v907_v28  }
  0x62   :  { %1060 = vperm.xlu1 %2089, %v926_v29  }
  0x63   :  { %1055 = vperm.xlu0 %2088, %v925_v30  }
  0x66   :  { %980 = vperm.xlu1 %2089, %v910_v31  }
  0x67   :  { %975 = vperm.xlu0 %2088, %v909_v32  }
  0x6a   :  { %1070 = vperm.xlu1 %2089, %v928_v33  }
  0x6b   :  { %1065 = vperm.xlu0 %2088, %v927_v34  }
  0x6e   :  { %990 = vperm.xlu1 %2089, %v912_v35  }
  0x6f   :  { %985 = vperm.xlu0 %2088, %v911_v36  }
  0x72   :  { %1080 = vperm.xlu1 %2089, %v930_v37  }
  0x73   :  { %1075 = vperm.xlu0 %2088, %v929_v38  }
  0x76   :  { %1000 = vperm.xlu1 %2089, %v914_v39  }
  0x77   :  { %995 = vperm.xlu0 %2088, %v913_v40  }
  0x7a   :  { %1090 = vperm.xlu1 %2089, %v932_v41  }
  0x7b   :  { %1085 = vperm.xlu0 %2088, %v931_v42  }
  0x7e   :  { %1010 = vperm.xlu1 %2089, %v916_v43  }
  0x7f   :  { %1005 = vperm.xlu0 %2088, %v915_v44  }
  0x81   :  { %v112_v52 = vpop.permute.xlu1 %111  ;;  %v102_v53 = vpop.permute.xlu0 %101 }
  0x82   :  { %1593 = vperm.xlu1 %2089, %v1583_v45  }
  0x83   :  { %1588 = vperm.xlu0 %2088, %v1582_v46  }
  0x85   :  { %v117_v54 = vpop.permute.xlu1 %116 }
  0x86   :  { %1603 = vperm.xlu1 %2089, %v1585_v47   ;;  %v107_v55 = vpop.permute.xlu0 %106 }
  0x87   :  { %1598 = vperm.xlu0 %2088, %v1584_v48  }
  0x89   :  { %v127_v56 = vpop.permute.xlu1 %126 }
  0x8a   :  { %v122_v57 = vpop.permute.xlu0 %121 }
  0x8d   :  { %v137_v58 = vpop.permute.xlu1 %136 }
  0x8e   :  { %v132_v59 = vpop.permute.xlu0 %131 }
  0x91   :  { %v147_v0 = vpop.permute.xlu1 %146 }
  0x92   :  { %v142_v2 = vpop.permute.xlu0 %141 }
  0x95   :  { %v157_v13 = vpop.permute.xlu1 %156 }
  0x96   :  { %v152_v17 = vpop.permute.xlu0 %151 }
  0x99   :  { %v167_v35 = vpop.permute.xlu1 %166 }
  0x9a   :  { %v2651_v39 = vpop.permute.xlu0 %161 }
  0xe8   :  { %v1909_v60 = vpop.f32.mrb[0].mxu0 }
  0xe9   :  { %v428_v61 = vadd.f32 %v1909_v60, %v107_v55  ;;  %v422_v62 = vpop.f32.mrb[1].mxu0 }
  0xea   :  { %v423_v63 = vadd.f32 %v422_v62, %v102_v53 }
  0xeb   :  { %v646_v1 = vmin.f32 %v428_v61, 0.0  ;;  %v582_v18 = vmax.f32 %v428_v61, 0.0 }
  0xec   :  { %v645_v3 = vmin.f32 %v423_v63, 0.0  ;;  %v1912_v4 = vpop.f32.mrb[2].mxu0  ;;  %v581_v21 = vmax.f32 %v423_v63, 0.0  ;;  %v177_v63 = vpop.permute.xlu1 %176 }
  0xed   :  { %v679_v5 = vmul.f32 1.442695, %v646_v1  ;;  %v438_v6 = vadd.f32 %v1912_v4, %v117_v54  ;;  %v432_v7 = vpop.f32.mrb[3].mxu0  ;;  %v614_v31 = vmul.f32 1.050701, %v582_v18 }
  0xee   :  { %v677_v8 = vmul.f32 1.442695, %v645_v3  ;;  %v433_v9 = vadd.f32 %v432_v7, %v112_v52  ;;  %v613_v36 = vmul.f32 1.050701, %v581_v21  ;;  %v2657_v7 = vpop.permute.xlu0 %171 }
  0xef   :  { %2090 = vpow2.f32 %v679_v5  ;;  %v648_v10 = vmin.f32 %v438_v6, 0.0  ;;  %v584_v22 = vmax.f32 %v438_v6, 0.0 }
  0xf0   :  { %2092 = vpow2.f32 %v677_v8  ;;  %v647_v11 = vmin.f32 %v433_v9, 0.0  ;;  %v1915_v12 = vpop.f32.mrb[4].mxu0  ;;  %v583_v24 = vmax.f32 %v433_v9, 0.0 }
  0xf1   :  { %v683_v14 = vmul.f32 1.442695, %v648_v10  ;;  %v448_v15 = vadd.f32 %v1915_v12, %v127_v56  ;;  %v442_v16 = vpop.f32.mrb[5].mxu0  ;;  %v616_v37 = vmul.f32 1.050701, %v584_v22 }
  0xf2   :  { %v681_v19 = vmul.f32 1.442695, %v647_v11  ;;  %v443_v20 = vadd.f32 %v442_v16, %v122_v57  ;;  %v615_v40 = vmul.f32 1.050701, %v583_v24 }
  0xf3   :  { %2094 = vpow2.f32 %v683_v14  ;;  %v650_v23 = vmin.f32 %v448_v15, 0.0  ;;  %v586_v27 = vmax.f32 %v448_v15, 0.0 }
  0xf4   :  { %2096 = vpow2.f32 %v681_v19  ;;  %v649_v25 = vmin.f32 %v443_v20, 0.0  ;;  %v1918_v26 = vpop.f32.mrb[6].mxu0  ;;  %v585_v32 = vmax.f32 %v443_v20, 0.0 }
  0xf5   :  { %v687_v28 = vmul.f32 1.442695, %v650_v23  ;;  %v458_v29 = vadd.f32 %v1918_v26, %v137_v58  ;;  %v452_v30 = vpop.f32.mrb[7].mxu0  ;;  %v618_v45 = vmul.f32 1.050701, %v586_v27 }
  0xf6   :  { %v685_v33 = vmul.f32 1.442695, %v649_v25  ;;  %v453_v34 = vadd.f32 %v452_v30, %v132_v59  ;;  %v2653_v52 = vmul.f32 1.050701, %v585_v32 }
  0xf7   :  { %2098 = vpow2.f32 %v687_v28  ;;  %v652_v38 = vmin.f32 %v458_v29, 0.0  ;;  %v588_v41 = vmax.f32 %v458_v29, 0.0 }
  0xf8   :  { %2100 = vpow2.f32 %v685_v33  ;;  %v651_v42 = vmin.f32 %v453_v34, 0.0  ;;  %v1921_v43 = vpop.f32.mrb[8].mxu0  ;;  %v587_v56 = vmax.f32 %v453_v34, 0.0  ;;  %v2661_v33 = vpop.permute.xlu0 %181 }
  0xf9   :  { %v2091_v44 = vpop.eup %2090  ;;  %v691_v46 = vmul.f32 1.442695, %v652_v38  ;;  %v468_v47 = vadd.f32 %v1921_v43, %v147_v0  ;;  %v462_v48 = vpop.f32.mrb[9].mxu0  ;;  %v2655_v59 = vmul.f32 1.050701, %v588_v41 }
  0xfa   :  { %v2093_v50 = vpop.eup %2092  ;;  %v742_v51 = vmul.f32 1.7580993, %v2091_v44  ;;  %v689_v53 = vmul.f32 1.442695, %v651_v42  ;;  %v463_v54 = vadd.f32 %v462_v48, %v142_v2  ;;  %v619_v16 = vmul.f32 1.050701, %v587_v56 }
  0xfb   :  { %v741_v55 = vmul.f32 1.7580993, %v2093_v50  ;;  %2102 = vpow2.f32 %v691_v46  ;;  %v654_v57 = vmin.f32 %v468_v47, 0.0  ;;  %v590_v1 = vmax.f32 %v468_v47, 0.0 }
  0xfc   :  { %v774_v58 = vadd.f32 %v742_v51, %v614_v31  ;;  %2104 = vpow2.f32 %v689_v53  ;;  %v653_v60 = vmin.f32 %v463_v54, 0.0  ;;  %v1924_v61 = vpop.f32.mrb[10].mxu0  ;;  %v589_v9 = vmax.f32 %v463_v54, 0.0 }
  0xfd   :  { %v2095_v62 = vpop.eup %2094  ;;  %v773_v0 = vadd.f32 %v741_v55, %v613_v36  ;;  %v695_v3 = vmul.f32 1.442695, %v654_v57  ;;  %v478_v4 = vadd.f32 %v1924_v61, %v157_v13  ;;  %v472_v5 = vpop.f32.mrb[11].mxu0  ;;  %v622_v27 = vmul.f32 1.050701, %v590_v1 }
  0xfe   :  { %v2097_v6 = vpop.eup %2096  ;;  %v1744_v2 = vadd.f32 -1.7580993, %v774_v58  ;;  %v744_v8 = vmul.f32 1.7580993, %v2095_v62  ;;  %v473_v10 = vadd.f32 %v472_v5, %v152_v17  ;;  %v693_v14 = vmul.f32 1.442695, %v653_v60  ;;  %v187_v17 = vpop.permute.xlu1 %186 }
  0xff   :  { %v1743_v11 = vadd.f32 -1.7580993, %v773_v0  ;;  %v743_v12 = vmul.f32 1.7580993, %v2097_v6  ;;  %2106 = vpow2.f32 %v695_v3  ;;  %v592_v18 = vmax.f32 %v478_v4, 0.0 }
 0x100   :  { %v776_v15 = vadd.f32 %v744_v8, %v616_v37  ;;  %v656_v19 = vmin.f32 %v478_v4, 0.0  ;;  %v1927_v20 = vpop.f32.mrb[12].mxu0  ;;  %2108 = vpow2.f32 %v693_v14  ;;  %v655_v13 = vmin.f32 %v473_v10, 0.0  ;;  %v192_v4 = vpop.permute.xlu0 %191 }
 0x101   :  { %v2099_v21 = vpop.eup %2098  ;;  %v775_v22 = vadd.f32 %v743_v12, %v615_v40  ;;  %v488_v23 = vadd.f32 %v1927_v20, %v167_v35  ;;  %v482_v24 = vpop.f32.mrb[13].mxu0  ;;  %v591_v28 = vmax.f32 %v473_v10, 0.0  ;;  %v2659_v30 = vmul.f32 1.050701, %v589_v9 }
 0x102   :  { %v2101_v25 = vpop.eup %2100  ;;  %v746_v26 = vmul.f32 1.7580993, %v2099_v21  ;;  %v699_v31 = vmul.f32 1.442695, %v656_v19  ;;  %v1972_v32 = vpack.c.bf16 %v1744_v2, %v1743_v11  ;;  %v1746_v34 = vadd.f32 -1.7580993, %v776_v15  ;;  %v197_v61 = vpop.permute.xlu1 %196 }
 0x103   :  { %v745_v29 = vmul.f32 1.7580993, %v2101_v25  ;;  %v697_v37 = vmul.f32 1.442695, %v655_v13  ;;  %v483_v38 = vadd.f32 %v482_v24, %v2651_v39  ;;  %v1745_v41 = vadd.f32 -1.7580993, %v775_v22 }
 0x104   :  { %v778_v36 = vadd.f32 %v746_v26, %v618_v45  ;;  %v1930_v40 = vpop.f32.mrb[14].mxu0  ;;  %v2664_v42 = vmul.f32 1.050701, %v592_v18  ;;  %2110 = vpow2.f32 %v699_v31  ;;  %v658_v43 = vmin.f32 %v488_v23, 0.0  ;;  %1973 = vmatpush1.bf16.msra.mxu0 %v1972_v32  ;;  %2067 = vmatpush1.bf16.msra.mxu1 %v1972_v32 }
 0x105   :  { %v2103_v35 = vpop.eup %2102  ;;  %v492_v44 = vpop.f32.mrb[15].mxu0  ;;  %v2666_v48 = vmul.f32 1.050701, %v591_v28  ;;  %2112 = vpow2.f32 %v697_v37  ;;  %v594_v50 = vmax.f32 %v488_v23, 0.0  ;;  %1974 = vmatprep.subr.bf16.mxu0 %v2243_v49  ;;  %2052 = vmatprep.subr.bf16.mxu1 %v2243_v49  ;;  %v777_v39 = vadd.f32 %v745_v29, %v2653_v52 }
 0x106   :  { %v2105_v46 = vpop.eup %2104  ;;  %v748_v47 = vmul.f32 1.7580993, %v2103_v35  ;;  %v703_v51 = vmul.f32 1.442695, %v658_v43  ;;  %v498_v53 = vadd.f32 %v1930_v40, %v177_v63  ;;  %v1748_v54 = vadd.f32 -1.7580993, %v778_v36  ;;  %v207_v24 = vpop.permute.xlu1 %206 }
 0x107   :  { %v747_v45 = vmul.f32 1.7580993, %v2105_v46  ;;  %v593_v56 = vmax.f32 %v483_v38, 0.0  ;;  %v657_v57 = vmin.f32 %v483_v38, 0.0  ;;  %v493_v1 = vadd.f32 %v492_v44, %v2657_v7  ;;  %v202_v29 = vpop.permute.xlu0 %201 }
 0x108   :  { %v780_v55 = vadd.f32 %v748_v47, %v2655_v59  ;;  %v1933_v58 = vpop.f32.mrb[16].mxu0  ;;  %2114 = vpow2.f32 %v703_v51  ;;  %v660_v0 = vmin.f32 %v498_v53, 0.0  ;;  %v596_v6 = vmax.f32 %v498_v53, 0.0 }
 0x109   :  { %v2107_v60 = vpop.eup %2106  ;;  %v779_v62 = vadd.f32 %v747_v45, %v619_v16  ;;  %v502_v3 = vpop.f32.mrb[17].mxu0  ;;  %v701_v52 = vmul.f32 1.442695, %v657_v57  ;;  %v1975_v2 = vpack.c.bf16 %v1746_v34, %v1745_v41  ;;  %v1747_v8 = vadd.f32 -1.7580993, %v777_v39 }
 0x10a   :  { %v750_v5 = vmul.f32 1.7580993, %v2107_v60  ;;  %v2109_v63 = vpop.eup %2108  ;;  %v2673_v9 = vmul.f32 1.050701, %v594_v50  ;;  %v707_v59 = vmul.f32 1.442695, %v660_v0  ;;  %v2675_v10 = vadd.f32 %v1933_v58, %v187_v17 }
 0x10b   :  { %v749_v12 = vmul.f32 1.7580993, %v2109_v63  ;;  %v2677_v14 = vmul.f32 1.050701, %v593_v56  ;;  %2116 = vpow2.f32 %v701_v52  ;;  %1976 = vmatpush1.bf16.msra.mxu0 %v1975_v2  ;;  %2068 = vmatpush1.bf16.msra.mxu1 %v1975_v2  ;;  %v1750_v15 = vadd.f32 -1.7580993, %v780_v55 }
 0x10c   :  { %v782_v11 = vadd.f32 %v750_v5, %v622_v27  ;;  %v1936_v7 = vpop.f32.mrb[18].mxu0  ;;  %2118 = vpow2.f32 %v707_v59  ;;  %v659_v16 = vmin.f32 %v493_v1, 0.0  ;;  %v662_v18 = vmin.f32 %v2675_v10, 0.0  ;;  %1977 = vmatprep.subr.bf16.mxu0 %v2243_v49  ;;  %2053 = vmatprep.subr.bf16.mxu1 %v2243_v49 }
 0x10d   :  { %v512_v19 = vpop.f32.mrb[19].mxu0  ;;  %v1749_v20 = vadd.f32 -1.7580993, %v779_v62  ;;  %v2682_v21 = vmul.f32 1.050701, %v596_v6  ;;  %v595_v22 = vmax.f32 %v493_v1, 0.0  ;;  %v503_v13 = vadd.f32 %v502_v3, %v2661_v33 }
 0x10e   :  { %v2111_v23 = vpop.eup %2110  ;;  %v781_v25 = vadd.f32 %v749_v12, %v2659_v30  ;;  %v705_v26 = vmul.f32 1.442695, %v659_v16  ;;  %v711_v27 = vmul.f32 1.442695, %v662_v18  ;;  %v1978_v28 = vpack.c.bf16 %v1748_v54, %v1747_v8  ;;  %v217_v54 = vpop.permute.xlu1 %216 }
 0x10f   :  { %v2113_v17 = vpop.eup %2112  ;;  %v1752_v31 = vadd.f32 -1.7580993, %v782_v11  ;;  %v752_v32 = vmul.f32 1.7580993, %v2111_v23  ;;  %v598_v34 = vmax.f32 %v2675_v10, 0.0  ;;  %v661_v36 = vmin.f32 %v503_v13, 0.0 }
 0x110   :  { %v751_v37 = vmul.f32 1.7580993, %v2113_v17  ;;  %2120 = vpow2.f32 %v705_v26  ;;  %1979 = vmatpush1.bf16.msra.mxu0 %v1978_v28  ;;  %2069 = vmatpush1.bf16.msra.mxu1 %v1978_v28  ;;  %v518_v38 = vadd.f32 %v1936_v7, %v197_v61  ;;  %v513_v33 = vadd.f32 %v512_v19, %v192_v4  ;;  %v1939_v40 = vpop.f32.mrb[20].mxu0  ;;  %v212_v61 = vpop.permute.xlu0 %211 }
 0x111   :  { %v784_v35 = vadd.f32 %v752_v32, %v2664_v42  ;;  %v2688_v30 = vmul.f32 1.050701, %v595_v22  ;;  %2122 = vpow2.f32 %v711_v27  ;;  %v709_v41 = vmul.f32 1.442695, %v661_v36  ;;  %1980 = vmatprep.subr.bf16.mxu0 %v2243_v49  ;;  %2054 = vmatprep.subr.bf16.mxu1 %v2243_v49  ;;  %v522_v43 = vpop.f32.mrb[21].mxu0 }
 0x112   :  { %v2115_v44 = vpop.eup %2114  ;;  %v1751_v46 = vadd.f32 -1.7580993, %v781_v25  ;;  %v783_v47 = vadd.f32 %v751_v37, %v2666_v48  ;;  %v597_v50 = vmax.f32 %v503_v13, 0.0  ;;  %v664_v39 = vmin.f32 %v518_v38, 0.0  ;;  %v227_v19 = vpop.permute.xlu1 %226 }
 0x113   :  { %v754_v45 = vmul.f32 1.7580993, %v2115_v44  ;;  %2124 = vpow2.f32 %v709_v41  ;;  %v600_v51 = vmax.f32 %v518_v38, 0.0  ;;  %v663_v53 = vmin.f32 %v513_v33, 0.0 }
 0x114   :  { %v1942_v42 = vpop.f32.mrb[22].mxu0  ;;  %v1754_v55 = vadd.f32 -1.7580993, %v784_v35  ;;  %v715_v56 = vmul.f32 1.442695, %v664_v39  ;;  %v599_v57 = vmax.f32 %v513_v33, 0.0  ;;  %v1981_v58 = vpack.c.bf16 %v1750_v15, %v1749_v20  ;;  %v222_v25 = vpop.permute.xlu0 %221 }
 0x115   :  { %v2117_v60 = vpop.eup %2116  ;;  %v1753_v62 = vadd.f32 -1.7580993, %v783_v47  ;;  %v786_v0 = vadd.f32 %v754_v45, %v2673_v9  ;;  %v713_v1 = vmul.f32 1.442695, %v663_v53  ;;  %v528_v3 = vadd.f32 %v1939_v40, %v207_v24  ;;  %v532_v48 = vpop.f32.mrb[23].mxu0 }
 0x116   :  { %v2119_v4 = vpop.eup %2118  ;;  %v753_v5 = vmul.f32 1.7580993, %v2117_v60  ;;  %2126 = vpow2.f32 %v715_v56  ;;  %1982 = vmatpush1.bf16.msra.mxu0 %v1981_v58  ;;  %2070 = vmatpush1.bf16.msra.mxu1 %v1981_v58  ;;  %v2694_v52 = vadd.f32 %v522_v43, %v202_v29  ;;  %v1984_v6 = vpack.c.bf16 %v1752_v31, %v1751_v46  ;;  %v237_v47 = vpop.permute.xlu1 %236 }
 0x117   :  { %v630_v2 = vmul.f32 1.050701, %v598_v34  ;;  %v2696_v63 = vmul.f32 1.050701, %v597_v50  ;;  %2128 = vpow2.f32 %v713_v1  ;;  %1983 = vmatprep.subr.bf16.mxu0 %v2243_v49  ;;  %2055 = vmatprep.subr.bf16.mxu1 %v2243_v49  ;;  %v756_v9 = vmul.f32 1.7580993, %v2119_v4 }
 0x118   :  { %v1945_v8 = vpop.f32.mrb[24].mxu0  ;;  %v666_v59 = vmin.f32 %v528_v3, 0.0  ;;  %v665_v10 = vmin.f32 %v2694_v52, 0.0  ;;  %v2701_v12 = vmul.f32 1.050701, %v600_v51  ;;  %v538_v15 = vadd.f32 %v1942_v42, %v217_v54  ;;  %v232_v42 = vpop.permute.xlu0 %231 }
 0x119   :  { %v542_v11 = vpop.f32.mrb[25].mxu0  ;;  %v2703_v7 = vmul.f32 1.050701, %v599_v57  ;;  %v533_v16 = vadd.f32 %v532_v48, %v212_v61  ;;  %v1756_v20 = vadd.f32 -1.7580993, %v786_v0  ;;  %v785_v22 = vadd.f32 %v753_v5, %v2677_v14 }
 0x11a   :  { %v2121_v18 = vpop.eup %2120  ;;  %v719_v13 = vmul.f32 1.442695, %v666_v59  ;;  %1985 = vmatpush1.bf16.msra.mxu0 %v1984_v6  ;;  %2071 = vmatpush1.bf16.msra.mxu1 %v1984_v6  ;;  %v1987_v23 = vpack.c.bf16 %v1754_v55, %v1753_v62  ;;  %v602_v27 = vmax.f32 %v528_v3, 0.0  ;;  %v717_v28 = vmul.f32 1.442695, %v665_v10 }
 0x11b   :  { %v2123_v24 = vpop.eup %2122  ;;  %v755_v26 = vmul.f32 1.7580993, %v2121_v18  ;;  %1986 = vmatprep.subr.bf16.mxu0 %v2243_v49  ;;  %2056 = vmatprep.subr.bf16.mxu1 %v2243_v49  ;;  %v788_v17 = vadd.f32 %v756_v9, %v2682_v21  ;;  %v668_v31 = vmin.f32 %v538_v15, 0.0  ;;  %v667_v36 = vmin.f32 %v533_v16, 0.0 }
 0x11c   :  { %v758_v29 = vmul.f32 1.7580993, %v2123_v24  ;;  %2130 = vpow2.f32 %v719_v13  ;;  %v1948_v32 = vpop.f32.mrb[26].mxu0  ;;  %v2710_v37 = vadd.f32 %v1945_v8, %v227_v19  ;;  %v1755_v33 = vadd.f32 -1.7580993, %v785_v22 }
 0x11d   :  { %v2125_v14 = vpop.eup %2124  ;;  %v787_v34 = vadd.f32 %v755_v26, %v2688_v30  ;;  %2132 = vpow2.f32 %v717_v28  ;;  %v552_v38 = vpop.f32.mrb[27].mxu0  ;;  %v601_v40 = vmax.f32 %v2694_v52, 0.0  ;;  %v604_v35 = vmax.f32 %v538_v15, 0.0 }
 0x11e   :  { %v723_v41 = vmul.f32 1.442695, %v668_v31  ;;  %1988 = vmatpush1.bf16.msra.mxu0 %v1987_v23  ;;  %2072 = vmatpush1.bf16.msra.mxu1 %v1987_v23  ;;  %v634_v21 = vmul.f32 1.050701, %v602_v27  ;;  %v603_v43 = vmax.f32 %v533_v16, 0.0  ;;  %v2713_v46 = vadd.f32 %v542_v11, %v222_v25  ;;  %v247_v11 = vpop.permute.xlu1 %246 }
 0x11f   :  { %v721_v44 = vmul.f32 1.442695, %v667_v36  ;;  %1989 = vmatprep.subr.bf16.mxu0 %v2243_v49  ;;  %2057 = vmatprep.subr.bf16.mxu1 %v2243_v49  ;;  %v1758_v50 = vadd.f32 -1.7580993, %v788_v17  ;;  %v790_v39 = vadd.f32 %v758_v29, %v630_v2  ;;  %v757_v45 = vmul.f32 1.7580993, %v2125_v14 }
 0x120   :  { %v2127_v30 = vpop.eup %2126  ;;  %2134 = vpow2.f32 %v723_v41  ;;  %v1951_v51 = vpop.f32.mrb[28].mxu0  ;;  %v1757_v54 = vadd.f32 -1.7580993, %v787_v34  ;;  %v670_v56 = vmin.f32 %v2710_v37, 0.0  ;;  %v633_v60 = vmul.f32 1.050701, %v601_v40 }
 0x121   :  { %v2129_v53 = vpop.eup %2128  ;;  %v760_v55 = vmul.f32 1.7580993, %v2127_v30  ;;  %2136 = vpow2.f32 %v721_v44  ;;  %v562_v57 = vpop.f32.mrb[29].mxu0  ;;  %v636_v61 = vmul.f32 1.050701, %v604_v35  ;;  %v1990_v62 = vpack.c.bf16 %v1756_v20, %v1755_v33 }
 0x122   :  { %v759_v58 = vmul.f32 1.7580993, %v2129_v53  ;;  %v635_v0 = vmul.f32 1.050701, %v603_v43  ;;  %v727_v1 = vmul.f32 1.442695, %v670_v56  ;;  %v789_v5 = vadd.f32 %v757_v45, %v2696_v63  ;;  %v242_v20 = vpop.permute.xlu0 %241 }
 0x123   :  { %v669_v3 = vmin.f32 %v2713_v46, 0.0  ;;  %v1760_v4 = vadd.f32 -1.7580993, %v790_v39  ;;  %1991 = vmatpush1.bf16.msra.mxu0 %v1990_v62  ;;  %2073 = vmatpush1.bf16.msra.mxu1 %v1990_v62  ;;  %v2720_v52 = vadd.f32 %v1948_v32, %v237_v47  ;;  %v2722_v6 = vadd.f32 %v552_v38, %v232_v42  ;;  %v257_v38 = vpop.permute.xlu1 %256 }
 0x124   :  { %v1954_v48 = vpop.f32.mrb[30].mxu0  ;;  %v792_v8 = vadd.f32 %v760_v55, %v2701_v12  ;;  %2138 = vpow2.f32 %v727_v1  ;;  %1992 = vmatprep.subr.bf16.mxu0 %v2243_v49  ;;  %2058 = vmatprep.subr.bf16.mxu1 %v2243_v49  ;;  %v1993_v59 = vpack.c.bf16 %v1758_v50, %v1757_v54  ;;  %v791_v63 = vadd.f32 %v759_v58, %v2703_v7 }
 0x125   :  { %v572_v2 = vpop.f32.mrb[31].mxu0  ;;  %v725_v9 = vmul.f32 1.442695, %v669_v3  ;;  %v606_v15 = vmax.f32 %v2710_v37, 0.0  ;;  %v605_v16 = vmax.f32 %v2713_v46, 0.0  ;;  %v672_v18 = vmin.f32 %v2720_v52, 0.0 }
 0x126   :  { %v2131_v10 = vpop.eup %2130  ;;  %v671_v22 = vmin.f32 %v2722_v6, 0.0  ;;  %v2732_v13 = vadd.f32 %v1951_v51, %v247_v11  ;;  %v1759_v23 = vadd.f32 -1.7580993, %v789_v5  ;;  %v1762_v7 = vadd.f32 -1.7580993, %v792_v8 }
 0x127   :  { %v2133_v19 = vpop.eup %2132  ;;  %v762_v12 = vmul.f32 1.7580993, %v2131_v10  ;;  %2140 = vpow2.f32 %v725_v9  ;;  %v731_v25 = vmul.f32 1.442695, %v672_v18  ;;  %1994 = vmatpush1.bf16.msra.mxu0 %v1993_v59  ;;  %2074 = vmatpush1.bf16.msra.mxu1 %v1993_v59  ;;  %v2734_v28 = vadd.f32 %v562_v57, %v242_v20 }
 0x128   :  { %v761_v24 = vmul.f32 1.7580993, %v2133_v19  ;;  %v729_v27 = vmul.f32 1.442695, %v671_v22  ;;  %1995 = vmatprep.subr.bf16.mxu0 %v2243_v49  ;;  %2059 = vmatprep.subr.bf16.mxu1 %v2243_v49  ;;  %v1761_v29 = vadd.f32 -1.7580993, %v791_v63  ;;  %v1996_v41 = vpack.c.bf16 %v1760_v4, %v1759_v23 }
 0x129   :  { %v794_v26 = vadd.f32 %v762_v12, %v634_v21  ;;  %2142 = vpow2.f32 %v731_v25  ;;  %v674_v32 = vmin.f32 %v2732_v13, 0.0  ;;  %v638_v36 = vmul.f32 1.050701, %v606_v15  ;;  %v252_v21 = vpop.permute.xlu0 %251 }
 0x12a   :  { %v2135_v17 = vpop.eup %2134  ;;  %v793_v31 = vadd.f32 %v761_v24, %v633_v60  ;;  %v637_v37 = vmul.f32 1.050701, %v605_v16  ;;  %2144 = vpow2.f32 %v729_v27  ;;  %v673_v46 = vmin.f32 %v2734_v28, 0.0 }
 0x12b   :  { %v2137_v14 = vpop.eup %2136  ;;  %v764_v34 = vmul.f32 1.7580993, %v2135_v17  ;;  %v1764_v33 = vadd.f32 -1.7580993, %v794_v26  ;;  %v735_v35 = vmul.f32 1.442695, %v674_v32  ;;  %v2740_v30 = vadd.f32 %v1954_v48, %v257_v38  ;;  %1997 = vmatpush1.bf16.msra.mxu0 %v1996_v41  ;;  %2075 = vmatpush1.bf16.msra.mxu1 %v1996_v41 }
 0x12c   :  { %v763_v40 = vmul.f32 1.7580993, %v2137_v14  ;;  %v1763_v43 = vadd.f32 -1.7580993, %v793_v31  ;;  %v2742_v50 = vadd.f32 %v572_v2, %v252_v21  ;;  %v1999_v39 = vpack.c.bf16 %v1762_v7, %v1761_v29  ;;  %1998 = vmatprep.subr.bf16.mxu0 %v2243_v49  ;;  %2060 = vmatprep.subr.bf16.mxu1 %v2243_v49 }
 0x12d   :  { %v796_v44 = vadd.f32 %v764_v34, %v636_v61  ;;  %2146 = vpow2.f32 %v735_v35  ;;  %v733_v53 = vmul.f32 1.442695, %v673_v46  ;;  %v676_v42 = vmin.f32 %v2740_v30, 0.0  ;;  %v861_v46 = vld [vmem:[%s3201_s3 + $0xc0] sm:$0xff] }
 0x12e   :  { %v795_v47 = vadd.f32 %v763_v40, %v635_v0  ;;  %v2139_v45 = vpop.eup %2138  ;;  %v675_v56 = vmin.f32 %v2742_v50, 0.0  ;;  %v608_v58 = vmax.f32 %v2720_v52, 0.0  ;;  %v2002_v61 = vpack.c.bf16 %v1764_v33, %v1763_v43 }
 0x12f   :  { %v1766_v51 = vadd.f32 -1.7580993, %v796_v44  ;;  %v766_v55 = vmul.f32 1.7580993, %v2139_v45  ;;  %2148 = vpow2.f32 %v733_v53  ;;  %v739_v60 = vmul.f32 1.442695, %v676_v42  ;;  %2000 = vmatpush1.bf16.msra.mxu0 %v1999_v39  ;;  %2076 = vmatpush1.bf16.msra.mxu1 %v1999_v39 }
 0x130   :  { %v1765_v54 = vadd.f32 -1.7580993, %v795_v47  ;;  %v607_v1 = vmax.f32 %v2722_v6, 0.0  ;;  %v737_v3 = vmul.f32 1.442695, %v675_v56  ;;  %2001 = vmatprep.subr.bf16.mxu0 %v2243_v49  ;;  %2061 = vmatprep.subr.bf16.mxu1 %v2243_v49  ;;  %v610_v59 = vmax.f32 %v2732_v13, 0.0 }
 0x131   :  { %v2141_v57 = vpop.eup %2140  ;;  %v798_v62 = vadd.f32 %v766_v55, %v638_v36  ;;  %2150 = vpow2.f32 %v739_v60  ;;  %v640_v8 = vmul.f32 1.050701, %v608_v58  ;;  %v609_v18 = vmax.f32 %v2734_v28, 0.0  ;;  %v837_v44 = vld [vmem:[%s3201_s3] sm:$0xff]  ;;  %v864_v47 = vld [vmem:[%s3201_s3 + $0xd8] sm:$0xff]  ;;  %v842_v39 = vld [vmem:[%s3201_s3 + $0x28] sm:$0xff] }
 0x132   :  { %v765_v0 = vmul.f32 1.7580993, %v2141_v57  ;;  %v2005_v48 = vpack.c.bf16 %v1766_v51, %v1765_v54  ;;  %2152 = vpow2.f32 %v737_v3  ;;  %v639_v6 = vmul.f32 1.050701, %v607_v1  ;;  %v866_v45 = vld [vmem:[%s3201_s3 + $0xe8] sm:$0xff]  ;;  %v841_v51 = vld [vmem:[%s3201_s3 + $0x20] sm:$0xff] }
 0x133   :  { %v2143_v4 = vpop.eup %2142  ;;  %v1768_v5 = vadd.f32 -1.7580993, %v798_v62  ;;  %2003 = vmatpush1.bf16.msra.mxu0 %v2002_v61  ;;  %2077 = vmatpush1.bf16.msra.mxu1 %v2002_v61  ;;  %v642_v12 = vmul.f32 1.050701, %v610_v59  ;;  %v612_v13 = vmax.f32 %v2740_v30, 0.0  ;;  %v611_v7 = vmax.f32 %v2742_v50, 0.0 }
 0x134   :  { %v797_v2 = vadd.f32 %v765_v0, %v637_v37  ;;  %v2145_v52 = vpop.eup %2144  ;;  %v768_v9 = vmul.f32 1.7580993, %v2143_v4  ;;  %2004 = vmatprep.subr.bf16.mxu0 %v2243_v49  ;;  %2062 = vmatprep.subr.bf16.mxu1 %v2243_v49  ;;  %v641_v26 = vmul.f32 1.050701, %v609_v18  ;;  %v840_v30 = vld [vmem:[%s3201_s3 + $0x18] sm:$0xff]  ;;  %v863_v50 = vld [vmem:[%s3201_s3 + $0xd0] sm:$0xff] }
 0x135   :  { %v767_v11 = vmul.f32 1.7580993, %v2145_v52  ;;  %v644_v14 = vmul.f32 1.050701, %v612_v13  ;;  %v643_v36 = vmul.f32 1.050701, %v611_v7 }
 0x136   :  { %v1767_v10 = vadd.f32 -1.7580993, %v797_v2  ;;  %v800_v63 = vadd.f32 %v768_v9, %v640_v8  ;;  %v865_v53 = vld [vmem:[%s3201_s3 + $0xe0] sm:$0xff]  ;;  %v844_v42 = vld [vmem:[%s3201_s3 + $0x38] sm:$0xff]  ;;  %v843_v55 = vld [vmem:[%s3201_s3 + $0x30] sm:$0xff] }
 0x137   :  { %v2147_v15 = vpop.eup %2146  ;;  %v799_v16 = vadd.f32 %v767_v11, %v639_v6  ;;  %2006 = vmatpush1.bf16.msra.mxu0 %v2005_v48  ;;  %2078 = vmatpush1.bf16.msra.mxu1 %v2005_v48  ;;  %v868_v54 = vld [vmem:[%s3201_s3 + $0xf8] sm:$0xff]  ;;  %v867_v56 = vld [vmem:[%s3201_s3 + $0xf0] sm:$0xff]  ;;  %v846_v57 = vld [vmem:[%s3201_s3 + $0x48] sm:$0xff] }
 0x138   :  { %v2008_v19 = vpack.c.bf16 %v1768_v5, %v1767_v10  ;;  %v1770_v20 = vadd.f32 -1.7580993, %v800_v63  ;;  %v770_v22 = vmul.f32 1.7580993, %v2147_v15  ;;  %2007 = vmatprep.subr.bf16.mxu0 %v2243_v49  ;;  %2063 = vmatprep.subr.bf16.mxu1 %v2243_v49  ;;  %v870_v58 = vld [vmem:[%s3201_s3 + $0x108] sm:$0xff]  ;;  %v845_v60 = vld [vmem:[%s3201_s3 + $0x40] sm:$0xff] }
 0x139   :  { %v1769_v23 = vadd.f32 -1.7580993, %v799_v16  ;;  %v2149_v24 = vpop.eup %2148  ;;  %v869_v61 = vld [vmem:[%s3201_s3 + $0x100] sm:$0xff]  ;;  %v848_v62 = vld [vmem:[%s3201_s3 + $0x58] sm:$0xff]  ;;  %v847_v1 = vld [vmem:[%s3201_s3 + $0x50] sm:$0xff] }
 0x13a   :  { %v802_v25 = vadd.f32 %v770_v22, %v642_v12  ;;  %v769_v27 = vmul.f32 1.7580993, %v2149_v24  ;;  %v872_v0 = vld [vmem:[%s3201_s3 + $0x118] sm:$0xff]  ;;  %v871_v3 = vld [vmem:[%s3201_s3 + $0x110] sm:$0xff]  ;;  %v850_v48 = vld [vmem:[%s3201_s3 + $0x68] sm:$0xff] }
 0x13b   :  { %v2011_v28 = vpack.c.bf16 %v1770_v20, %v1769_v23  ;;  %v2151_v17 = vpop.eup %2150  ;;  %2009 = vmatpush1.bf16.msra.mxu0 %v2008_v19  ;;  %2079 = vmatpush1.bf16.msra.mxu1 %v2008_v19  ;;  %v874_v4 = vld [vmem:[%s3201_s3 + $0x128] sm:$0xff]  ;;  %v849_v5 = vld [vmem:[%s3201_s3 + $0x60] sm:$0xff]  ;;  %v852_v52 = vld [vmem:[%s3201_s3 + $0x78] sm:$0xff] }
 0x13c   :  { %v2153_v29 = vpop.eup %2152  ;;  %v1772_v31 = vadd.f32 -1.7580993, %v802_v25  ;;  %v801_v32 = vadd.f32 %v769_v27, %v641_v26  ;;  %v772_v34 = vmul.f32 1.7580993, %v2151_v17  ;;  %2010 = vmatprep.subr.bf16.mxu0 %v2243_v49  ;;  %2064 = vmatprep.subr.bf16.mxu1 %v2243_v49  ;;  %v873_v2 = vld [vmem:[%s3201_s3 + $0x120] sm:$0xff]  ;;  %v876_v8 = vld [vmem:[%s3201_s3 + $0x138] sm:$0xff] }
 0x13d   :  { %v771_v37 = vmul.f32 1.7580993, %v2153_v29  ;;  %v851_v9 = vld [vmem:[%s3201_s3 + $0x70] sm:$0xff]  ;;  %v854_v10 = vld [vmem:[%s3201_s3 + $0x88] sm:$0xff]  ;;  %v853_v11 = vld [vmem:[%s3201_s3 + $0x80] sm:$0xff] }
 0x13e   :  { %v1771_v38 = vadd.f32 -1.7580993, %v801_v32  ;;  %v804_v33 = vadd.f32 %v772_v34, %v644_v14  ;;  %v875_v59 = vld [vmem:[%s3201_s3 + $0x130] sm:$0xff]  ;;  %v878_v6 = vld [vmem:[%s3201_s3 + $0x148] sm:$0xff]  ;;  %v877_v63 = vld [vmem:[%s3201_s3 + $0x140] sm:$0xff] }
 0x13f   :  { %v803_v40 = vadd.f32 %v771_v37, %v643_v36  ;;  %2012 = vmatpush1.bf16.msra.mxu0 %v2011_v28  ;;  %2080 = vmatpush1.bf16.msra.mxu1 %v2011_v28  ;;  %v856_v15 = vld [vmem:[%s3201_s3 + $0x98] sm:$0xff]  ;;  %v855_v18 = vld [vmem:[%s3201_s3 + $0x90] sm:$0xff]  ;;  %v858_v20 = vld [vmem:[%s3201_s3 + $0xa8] sm:$0xff] }
 0x140   :  { %v1774_v35 = vadd.f32 -1.7580993, %v804_v33  ;;  %v2014_v41 = vpack.c.bf16 %v1772_v31, %v1771_v38  ;;  %2013 = vmatprep.subr.bf16.mxu0 %v2243_v49  ;;  %2065 = vmatprep.subr.bf16.mxu1 %v2243_v49  ;;  %v880_v16 = vld [vmem:[%s3201_s3 + $0x158] sm:$0xff]  ;;  %v879_v19 = vld [vmem:[%s3201_s3 + $0x150] sm:$0xff]  ;;  %v882_v12 = vld [vmem:[%s3201_s3 + $0x168] sm:$0xff] }
 0x141   :  { %v1773_v21 = vadd.f32 -1.7580993, %v803_v40  ;;  %v857_v22 = vld [vmem:[%s3201_s3 + $0xa0] sm:$0xff]  ;;  %v860_v13 = vld [vmem:[%s3201_s3 + $0xb8] sm:$0xff]  ;;  %v859_v25 = vld [vmem:[%s3201_s3 + $0xb0] sm:$0xff] }
 0x142   :  { %v881_v23 = vld [vmem:[%s3201_s3 + $0x160] sm:$0xff]  ;;  %v884_v24 = vld [vmem:[%s3201_s3 + $0x178] sm:$0xff]  ;;  %v883_v7 = vld [vmem:[%s3201_s3 + $0x170] sm:$0xff] }
 0x143   :  { %v2017_v43 = vpack.c.bf16 %v1774_v35, %v1773_v21  ;;  %2015 = vmatpush1.bf16.msra.mxu0 %v2014_v41  ;;  %2081 = vmatpush1.bf16.msra.mxu1 %v2014_v41  ;;  %v886_v26 = vld [vmem:[%s3201_s3 + $0x188] sm:$0xff]  ;;  %v885_v27 = vld [vmem:[%s3201_s3 + $0x180] sm:$0xff]  ;;  %v888_v28 = vld [vmem:[%s3201_s3 + $0x198] sm:$0xff]  ;;  %v2952_v21 = vpop.permute.xlu0 %1015 }
 0x144   :  { %2016 = vmatprep.subr.bf16.mxu0 %v2243_v49  ;;  %2066 = vmatprep.subr.bf16.mxu1 %v2243_v49  ;;  %v839_v49 = vld [vmem:[%s3201_s3 + $0x10] sm:$0xff]  ;;  %v890_v29 = vld [vmem:[%s3201_s3 + $0x1a8] sm:$0xff]  ;;  %v889_v31 = vld [vmem:[%s3201_s3 + $0x1a0] sm:$0xff] }
 0x145   :  { %v887_v17 = vld [vmem:[%s3201_s3 + $0x190] sm:$0xff]  ;;  %v892_v32 = vld [vmem:[%s3201_s3 + $0x1b8] sm:$0xff]  ;;  %v894_v34 = vld [vmem:[%s3201_s3 + $0x1c8] sm:$0xff] }
 0x146   :  { %v891_v14 = vld [vmem:[%s3201_s3 + $0x1b0] sm:$0xff]  ;;  %v893_v36 = vld [vmem:[%s3201_s3 + $0x1c0] sm:$0xff]  ;;  %v896_v37 = vld [vmem:[%s3201_s3 + $0x1d8] sm:$0xff] }
 0x147   :  { %2018 = vmatpush1.bf16.msra.mxu0 %v2017_v43  ;;  %2082 = vmatpush1.bf16.msra.mxu1 %v2017_v43  ;;  %v895_v38 = vld [vmem:[%s3201_s3 + $0x1d0] sm:$0xff]  ;;  %v898_v33 = vld [vmem:[%s3201_s3 + $0x1e8] sm:$0xff]  ;;  %v897_v40 = vld [vmem:[%s3201_s3 + $0x1e0] sm:$0xff]  ;;  %v2954_v43 = vpop.permute.xlu1 %1020 }
 0x148   :  { %v900_v35 = vld [vmem:[%s3201_s3 + $0x1f8] sm:$0xff]  ;;  %v899_v41 = vld [vmem:[%s3201_s3 + $0x1f0] sm:$0xff] }
 0x14a   :  { %1158 = vmatmul.mubr.f32.vlgmr.msra.gmra.mrb[32].mxu0 %v837_v44  ;;  %1218 = vmatmul.mubr.f32.vlgmr.msra.gmra.mrb[0].mxu1 %v861_v46  ;;  %v936_v44 = vpop.permute.xlu0 %935 }
 0x14b   :  { %1162 = vmatprep.mubr.f32.mxu0 %v840_v30  ;;  %1222 = vmatprep.mubr.f32.mxu1 %v864_v47  ;;  %v941_v46 = vpop.permute.xlu1 %940 }
 0x14e   :  { %1163 = vmatmul.mubr.f32.gmra.mrb[34].mxu0 %v839_v49  ;;  %1223 = vmatmul.mubr.f32.gmra.mrb[2].mxu1 %v863_v50  ;;  %v2956_v30 = vpop.permute.xlu0 %1025 }
 0x14f   :  { %1167 = vmatprep.mubr.f32.mxu0 %v842_v39  ;;  %1227 = vmatprep.mubr.f32.mxu1 %v866_v45  ;;  %v2958_v47 = vpop.permute.xlu1 %1030 }
 0x152   :  { %1168 = vmatmul.mubr.f32.gmra.mrb[36].mxu0 %v841_v51  ;;  %1228 = vmatmul.mubr.f32.gmra.mrb[4].mxu1 %v865_v53  ;;  %v946_v49 = vpop.permute.xlu0 %945 }
 0x153   :  { %1172 = vmatprep.mubr.f32.mxu0 %v844_v42  ;;  %1232 = vmatprep.mubr.f32.mxu1 %v868_v54  ;;  %v2960_v50 = vpop.permute.xlu1 %950 }
 0x156   :  { %1173 = vmatmul.mubr.f32.gmra.mrb[38].mxu0 %v843_v55  ;;  %1233 = vmatmul.mubr.f32.gmra.mrb[6].mxu1 %v867_v56  ;;  %v2962_v39 = vpop.permute.xlu0 %1035 }
 0x157   :  { %1177 = vmatprep.mubr.f32.mxu0 %v846_v57  ;;  %1237 = vmatprep.mubr.f32.mxu1 %v870_v58  ;;  %v2964_v45 = vpop.permute.xlu1 %1040 }
 0x15a   :  { %1178 = vmatmul.mubr.f32.gmra.mrb[40].mxu0 %v845_v60  ;;  %1238 = vmatmul.mubr.f32.gmra.mrb[8].mxu1 %v869_v61  ;;  %v2966_v51 = vpop.permute.xlu0 %955 }
 0x15b   :  { %1182 = vmatprep.mubr.f32.mxu0 %v848_v62  ;;  %1242 = vmatprep.mubr.f32.mxu1 %v872_v0  ;;  %v2968_v53 = vpop.permute.xlu1 %960  ;;  %v1575_v0 = vld [vmem:[%s3203_s5 + $0x8] sm:$0xff] }
 0x15e   :  { %1183 = vmatmul.mubr.f32.gmra.mrb[42].mxu0 %v847_v1  ;;  %1243 = vmatmul.mubr.f32.gmra.mrb[10].mxu1 %v871_v3  ;;  %v2970_v42 = vpop.permute.xlu0 %1045 }
 0x15f   :  { %1187 = vmatprep.mubr.f32.mxu0 %v850_v48  ;;  %1247 = vmatprep.mubr.f32.mxu1 %v874_v4  ;;  %v2972_v54 = vpop.permute.xlu1 %1050 }
 0x162   :  { %1188 = vmatmul.mubr.f32.gmra.mrb[44].mxu0 %v849_v5  ;;  %1248 = vmatmul.mubr.f32.gmra.mrb[12].mxu1 %v873_v2  ;;  %v2974_v55 = vpop.permute.xlu0 %965 }
 0x163   :  { %1192 = vmatprep.mubr.f32.mxu0 %v852_v52  ;;  %1252 = vmatprep.mubr.f32.mxu1 %v876_v8  ;;  %v2976_v56 = vpop.permute.xlu1 %970 }
 0x166   :  { %1193 = vmatmul.mubr.f32.gmra.mrb[46].mxu0 %v851_v9  ;;  %1253 = vmatmul.mubr.f32.gmra.mrb[14].mxu1 %v875_v59  ;;  %v2978_v57 = vpop.permute.xlu0 %1055 }
 0x167   :  { %1197 = vmatprep.mubr.f32.mxu0 %v854_v10  ;;  %1257 = vmatprep.mubr.f32.mxu1 %v878_v6  ;;  %v2980_v58 = vpop.permute.xlu1 %1060 }
 0x16a   :  { %1198 = vmatmul.mubr.f32.gmra.mrb[48].mxu0 %v853_v11  ;;  %1258 = vmatmul.mubr.f32.gmra.mrb[16].mxu1 %v877_v63  ;;  %v2982_v60 = vpop.permute.xlu0 %975 }
 0x16b   :  { %1202 = vmatprep.mubr.f32.mxu0 %v856_v15  ;;  %1262 = vmatprep.mubr.f32.mxu1 %v880_v16  ;;  %v2984_v61 = vpop.permute.xlu1 %980 }
 0x16e   :  { %1203 = vmatmul.mubr.f32.gmra.mrb[50].mxu0 %v855_v18  ;;  %1263 = vmatmul.mubr.f32.gmra.mrb[18].mxu1 %v879_v19  ;;  %v2986_v62 = vpop.permute.xlu0 %1065 }
 0x16f   :  { %1207 = vmatprep.mubr.f32.mxu0 %v858_v20  ;;  %1267 = vmatprep.mubr.f32.mxu1 %v882_v12  ;;  %v2991_v1 = vpop.permute.xlu1 %1070 }
 0x172   :  { %1208 = vmatmul.mubr.f32.gmra.mrb[52].mxu0 %v857_v22  ;;  %1268 = vmatmul.mubr.f32.gmra.mrb[20].mxu1 %v881_v23  ;;  %v2993_v3 = vpop.permute.xlu0 %985 }
 0x173   :  { %1212 = vmatprep.mubr.f32.mxu0 %v860_v13  ;;  %1272 = vmatprep.mubr.f32.mxu1 %v884_v24  ;;  %v2995_v48 = vpop.permute.xlu1 %990 }
 0x176   :  { %1213 = vmatmul.mubr.f32.gmra.mrb[54].mxu0 %v859_v25  ;;  %1273 = vmatmul.mubr.f32.gmra.mrb[22].mxu1 %v883_v7  ;;  %v2997_v4 = vpop.permute.xlu0 %1075 }
 0x177   :  { %1277 = vmatprep.mubr.f32.mxu1 %v886_v26  ;;  %1670 = vmatprep.mubr.f32.mxu0 %v1575_v0  ;;  %v2999_v5 = vpop.permute.xlu1 %1080 }
 0x17a   :  { %1278 = vmatmul.mubr.f32.gmra.mrb[24].mxu1 %v885_v27  ;;  %v996_v2 = vpop.permute.xlu0 %995 }
 0x17b   :  { %1282 = vmatprep.mubr.f32.mxu1 %v888_v28  ;;  %v1001_v52 = vpop.permute.xlu1 %1000 }
 0x17e   :  { %1283 = vmatmul.mubr.f32.gmra.mrb[26].mxu1 %v887_v17  ;;  %v3001_v8 = vpop.permute.xlu0 %1085 }
 0x17f   :  { %1287 = vmatprep.mubr.f32.mxu1 %v890_v29  ;;  %v3003_v25 = vpop.permute.xlu1 %1090 }
 0x182   :  { %1288 = vmatmul.mubr.f32.gmra.mrb[28].mxu1 %v889_v31  ;;  %v1006_v7 = vpop.permute.xlu0 %1005 }
 0x183   :  { %1292 = vmatprep.mubr.f32.mxu1 %v892_v32 }
 0x186   :  { %1293 = vmatmul.mubr.f32.gmra.mrb[30].mxu1 %v891_v14 }
 0x187   :  { %1297 = vmatprep.mubr.f32.mxu1 %v894_v34 }
 0x18a   :  { %1298 = vmatmul.mubr.f32.gmra.mrb[32].mxu1 %v893_v36 }
 0x18b   :  { %1302 = vmatprep.mubr.f32.mxu1 %v896_v37 }
 0x18e   :  { %1303 = vmatmul.mubr.f32.gmra.mrb[34].mxu1 %v895_v38 }
 0x18f   :  { %1307 = vmatprep.mubr.f32.mxu1 %v898_v33 }
 0x192   :  { %1308 = vmatmul.mubr.f32.gmra.mrb[36].mxu1 %v897_v40 }
 0x193   :  { %1312 = vmatprep.mubr.f32.mxu1 %v900_v35 }
 0x196   :  { %1313 = vmatmul.mubr.f32.gmra.mrb[38].mxu1 %v899_v41 }
 0x21d   :  { %v1159_v9 = vpop.f32.mrb[32].mxu0  ;;  %v1219_v59 = vpop.f32.mrb[0].mxu1 }
 0x21e   :  { %v1160_v10 = vadd.f32 %v1159_v9, %v936_v44  ;;  %v1220_v6 = vadd.f32 %v1219_v59, %v996_v2  ;;  %v1221_v11 = vpop.f32.mrb[1].mxu1  ;;  %v1161_v63 = vpop.f32.mrb[33].mxu0 }
 0x220   :  { %v1382_v15 = vmin.f32 %v1160_v10, 0.0  ;;  %v1394_v16 = vmin.f32 %v1220_v6, 0.0  ;;  %v1318_v27 = vmax.f32 %v1160_v10, 0.0  ;;  %v1330_v28 = vmax.f32 %v1220_v6, 0.0 }
 0x221   :  { %v1164_v18 = vpop.f32.mrb[34].mxu0  ;;  %v1224_v19 = vpop.f32.mrb[2].mxu1 }
 0x222   :  { %v1414_v20 = vmul.f32 1.442695, %v1382_v15  ;;  %v1165_v12 = vadd.f32 %v1164_v18, %v941_v46  ;;  %v1438_v22 = vmul.f32 1.442695, %v1394_v16  ;;  %v1225_v23 = vadd.f32 %v1224_v19, %v1001_v52  ;;  %v1226_v13 = vpop.f32.mrb[3].mxu1  ;;  %v1166_v24 = vpop.f32.mrb[35].mxu0 }
 0x223   :  { %v1350_v41 = vmul.f32 1.050701, %v1318_v27  ;;  %v1011_v52 = vpop.permute.xlu1 %1010  ;;  %v1362_v9 = vmul.f32 1.050701, %v1330_v28 }
 0x224   :  { %2154 = vpow2.f32 %v1414_v20  ;;  %v1383_v26 = vmin.f32 %v1165_v12, 0.0  ;;  %v1395_v17 = vmin.f32 %v1225_v23, 0.0  ;;  %v1319_v32 = vmax.f32 %v1165_v12, 0.0 }
 0x225   :  { %2156 = vpow2.f32 %v1438_v22  ;;  %v1169_v29 = vpop.f32.mrb[36].mxu0  ;;  %v1229_v31 = vpop.f32.mrb[4].mxu1  ;;  %v1331_v40 = vmax.f32 %v1225_v23, 0.0 }
 0x226   :  { %v1416_v14 = vmul.f32 1.442695, %v1383_v26  ;;  %v1170_v34 = vadd.f32 %v1169_v29, %v946_v49  ;;  %v1230_v36 = vadd.f32 %v1229_v31, %v1006_v7  ;;  %v1231_v37 = vpop.f32.mrb[5].mxu1  ;;  %v1171_v38 = vpop.f32.mrb[37].mxu0  ;;  %v1440_v33 = vmul.f32 1.442695, %v1395_v17 }
 0x227   :  { %v1351_v59 = vmul.f32 1.050701, %v1319_v32  ;;  %v1363_v18 = vmul.f32 1.050701, %v1331_v40 }
 0x228   :  { %2158 = vpow2.f32 %v1416_v14  ;;  %v1384_v35 = vmin.f32 %v1170_v34, 0.0  ;;  %v1320_v44 = vmax.f32 %v1170_v34, 0.0  ;;  %v1396_v46 = vmin.f32 %v1230_v36, 0.0 }
 0x229   :  { %2160 = vpow2.f32 %v1440_v33  ;;  %v1174_v0 = vpop.f32.mrb[38].mxu0  ;;  %v1234_v2 = vpop.f32.mrb[6].mxu1  ;;  %v1332_v49 = vmax.f32 %v1230_v36, 0.0 }
 0x22a   :  { %v1418_v10 = vmul.f32 1.442695, %v1384_v35  ;;  %v1175_v6 = vadd.f32 %v1174_v0, %v2960_v50  ;;  %v1442_v11 = vmul.f32 1.442695, %v1396_v46  ;;  %v1235_v63 = vadd.f32 %v1234_v2, %v1011_v52  ;;  %v1236_v15 = vpop.f32.mrb[7].mxu1  ;;  %v1176_v16 = vpop.f32.mrb[39].mxu0 }
 0x22b   :  { %v1352_v12 = vmul.f32 1.050701, %v1320_v44  ;;  %v1364_v32 = vmul.f32 1.050701, %v1332_v49 }
 0x22c   :  { %2162 = vpow2.f32 %v1418_v10  ;;  %v1321_v19 = vmax.f32 %v1175_v6, 0.0  ;;  %v1385_v20 = vmin.f32 %v1175_v6, 0.0  ;;  %v1397_v22 = vmin.f32 %v1235_v63, 0.0 }
 0x22d   :  { %2164 = vpow2.f32 %v1442_v11  ;;  %v1179_v23 = vpop.f32.mrb[40].mxu0  ;;  %v1239_v13 = vpop.f32.mrb[8].mxu1  ;;  %v1333_v26 = vmax.f32 %v1235_v63, 0.0 }
 0x22e   :  { %v2155_v24 = vpop.eup %2154  ;;  %v1420_v7 = vmul.f32 1.442695, %v1385_v20  ;;  %v1180_v27 = vadd.f32 %v1179_v23, %v2966_v51  ;;  %v1240_v50 = vadd.f32 %v1239_v13, %v2952_v21  ;;  %v1241_v28 = vpop.f32.mrb[9].mxu1  ;;  %v1444_v14 = vmul.f32 1.442695, %v1397_v22 }
 0x22f   :  { %v1181_v17 = vpop.f32.mrb[41].mxu0  ;;  %v2157_v29 = vpop.eup %2156  ;;  %v1478_v31 = vmul.f32 1.7580993, %v2155_v24  ;;  %v3008_v34 = vmul.f32 1.050701, %v1321_v19 }
 0x230   :  { %2166 = vpow2.f32 %v1420_v7  ;;  %v1322_v36 = vmax.f32 %v1180_v27, 0.0  ;;  %v1386_v37 = vmin.f32 %v1180_v27, 0.0  ;;  %v1490_v33 = vmul.f32 1.7580993, %v2157_v29 }
 0x231   :  { %v1510_v38 = vadd.f32 %v1478_v31, %v1350_v41  ;;  %v1398_v40 = vmin.f32 %v1240_v50, 0.0  ;;  %v1184_v35 = vpop.f32.mrb[42].mxu0  ;;  %v1244_v44 = vpop.f32.mrb[10].mxu1  ;;  %v3010_v51 = vmul.f32 1.050701, %v1333_v26  ;;  %2168 = vpow2.f32 %v1444_v14 }
 0x232   :  { %v2159_v46 = vpop.eup %2158  ;;  %v1422_v21 = vmul.f32 1.442695, %v1386_v37  ;;  %v1185_v0 = vadd.f32 %v1184_v35, %v2968_v53  ;;  %v1246_v2 = vpop.f32.mrb[11].mxu1  ;;  %v1334_v49 = vmax.f32 %v1240_v50, 0.0  ;;  %v1245_v11 = vadd.f32 %v1244_v44, %v2954_v43 }
 0x233   :  { %v1186_v52 = vpop.f32.mrb[43].mxu0  ;;  %v2161_v10 = vpop.eup %2160  ;;  %v1479_v6 = vmul.f32 1.7580993, %v2159_v46  ;;  %v3014_v41 = vmul.f32 1.050701, %v1322_v36  ;;  %v1522_v19 = vadd.f32 %v1490_v33, %v1362_v9 }
 0x234   :  { %v1491_v63 = vmul.f32 1.7580993, %v2161_v10  ;;  %2170 = vpow2.f32 %v1422_v21  ;;  %v1446_v15 = vmul.f32 1.442695, %v1398_v40  ;;  %v3016_v16 = vadd.f32 -1.7580993, %v1510_v38 }
 0x235   :  { %v1387_v20 = vmin.f32 %v1185_v0, 0.0  ;;  %v1189_v22 = vpop.f32.mrb[44].mxu0  ;;  %v1249_v23 = vpop.f32.mrb[12].mxu1  ;;  %v1511_v13 = vadd.f32 %v1479_v6, %v1351_v59  ;;  %v1399_v24 = vmin.f32 %v1245_v11, 0.0  ;;  %v3019_v17 = vmul.f32 1.050701, %v1334_v49 }
 0x236   :  { %v2163_v53 = vpop.eup %2162  ;;  %2172 = vpow2.f32 %v1446_v15  ;;  %v1190_v7 = vadd.f32 %v1189_v22, %v2974_v55  ;;  %v1251_v26 = vpop.f32.mrb[13].mxu1  ;;  %v1523_v50 = vadd.f32 %v1491_v63, %v1363_v18  ;;  %v1323_v29 = vmax.f32 %v1185_v0, 0.0 }
 0x237   :  { %v1191_v27 = vpop.f32.mrb[45].mxu0  ;;  %v2165_v43 = vpop.eup %2164  ;;  %v1480_v28 = vmul.f32 1.7580993, %v2163_v53  ;;  %v1424_v14 = vmul.f32 1.442695, %v1387_v20  ;;  %v1335_v9 = vmax.f32 %v1245_v11, 0.0  ;;  %v1250_v59 = vadd.f32 %v1249_v23, %v2956_v30 }
 0x238   :  { %v1492_v31 = vmul.f32 1.7580993, %v2165_v43  ;;  %v3021_v36 = vadd.f32 -1.7580993, %v1522_v19  ;;  %v1448_v38 = vmul.f32 1.442695, %v1399_v24 }
 0x239   :  { %v1512_v37 = vadd.f32 %v1480_v28, %v1352_v12  ;;  %v1194_v33 = vpop.f32.mrb[46].mxu0  ;;  %v3024_v55 = vadd.f32 -1.7580993, %v1511_v13  ;;  %2174 = vpow2.f32 %v1424_v14  ;;  %v1324_v35 = vmax.f32 %v1190_v7, 0.0  ;;  %v1254_v44 = vpop.f32.mrb[14].mxu1 }
 0x23a   :  { %v2167_v40 = vpop.eup %2166  ;;  %v1388_v18 = vmin.f32 %v1190_v7, 0.0  ;;  %v1196_v46 = vpop.f32.mrb[47].mxu0  ;;  %v3026_v21 = vadd.f32 -1.7580993, %v1523_v50  ;;  %v3028_v2 = vmul.f32 1.050701, %v1323_v29  ;;  %2176 = vpow2.f32 %v1448_v38 }
 0x23b   :  { %v1481_v0 = vmul.f32 1.7580993, %v2167_v40  ;;  %v1524_v52 = vadd.f32 %v1492_v31, %v1364_v32  ;;  %v3030_v12 = vmul.f32 1.050701, %v1335_v9  ;;  %v1195_v30 = vadd.f32 %v1194_v33, %v2976_v56  ;;  %v2169_v6 = vpop.eup %2168  ;;  %v1256_v15 = vpop.f32.mrb[15].mxu1 }
 0x23c   :  { %v1426_v10 = vmul.f32 1.442695, %v1388_v18  ;;  %v3033_v49 = vadd.f32 -1.7580993, %v1512_v37  ;;  %v1336_v11 = vmax.f32 %v1250_v59, 0.0  ;;  %v1400_v63 = vmin.f32 %v1250_v59, 0.0 }
 0x23d   :  { %v1199_v19 = vpop.f32.mrb[48].mxu0  ;;  %v3035_v22 = vmul.f32 1.050701, %v1324_v35  ;;  %v1389_v23 = vmin.f32 %v1195_v30, 0.0  ;;  %v1255_v53 = vadd.f32 %v1254_v44, %v2958_v47  ;;  %v1259_v32 = vpop.f32.mrb[16].mxu1  ;;  %v1513_v24 = vadd.f32 %v1481_v0, %v3008_v34 }
 0x23e   :  { %v2171_v20 = vpop.eup %2170  ;;  %2178 = vpow2.f32 %v1426_v10  ;;  %v1201_v13 = vpop.f32.mrb[49].mxu0  ;;  %v1450_v56 = vmul.f32 1.442695, %v1400_v63  ;;  %v1200_v26 = vadd.f32 %v1199_v19, %v2982_v60  ;;  %v3040_v43 = vadd.f32 -1.7580993, %v1524_v52 }
 0x23f   :  { %v1482_v7 = vmul.f32 1.7580993, %v2171_v20  ;;  %v3042_v50 = vmul.f32 1.7580993, %v2169_v6  ;;  %v1428_v28 = vmul.f32 1.442695, %v1389_v23  ;;  %v3046_v47 = vadd.f32 %v1259_v32, %v2962_v39 }
 0x240   :  { %v2173_v27 = vpop.eup %2172  ;;  %2180 = vpow2.f32 %v1450_v56  ;;  %v1325_v31 = vmax.f32 %v1195_v30, 0.0  ;;  %v1261_v14 = vpop.f32.mrb[17].mxu1  ;;  %v1401_v37 = vmin.f32 %v1255_v53, 0.0  ;;  %v1390_v38 = vmin.f32 %v1200_v26, 0.0 }
 0x241   :  { %v1514_v29 = vadd.f32 %v1482_v7, %v3014_v41  ;;  %v1204_v9 = vpop.f32.mrb[50].mxu0  ;;  %v1494_v34 = vmul.f32 1.7580993, %v2173_v27  ;;  %2182 = vpow2.f32 %v1428_v28  ;;  %v1264_v60 = vpop.f32.mrb[18].mxu1  ;;  %v3048_v33 = vadd.f32 -1.7580993, %v1513_v24 }
 0x242   :  { %v1206_v59 = vpop.f32.mrb[51].mxu0  ;;  %v3050_v40 = vmul.f32 1.050701, %v1336_v11  ;;  %v1266_v35 = vpop.f32.mrb[19].mxu1  ;;  %v1337_v41 = vmax.f32 %v1255_v53, 0.0  ;;  %v1205_v39 = vadd.f32 %v1204_v9, %v2984_v61  ;;  %v1326_v30 = vmax.f32 %v1200_v26, 0.0 }
 0x243   :  { %v2175_v18 = vpop.eup %2174  ;;  %v1452_v44 = vmul.f32 1.442695, %v1401_v37  ;;  %v1430_v46 = vmul.f32 1.442695, %v1390_v38  ;;  %v3053_v52 = vadd.f32 -1.7580993, %v1514_v29  ;;  %v1265_v6 = vadd.f32 %v1264_v60, %v2964_v45 }
 0x244   :  { %v2177_v0 = vpop.eup %2176  ;;  %v3055_v10 = vmul.f32 1.050701, %v1325_v31  ;;  %v1526_v63 = vadd.f32 %v1494_v34, %v3019_v17  ;;  %v1402_v11 = vmin.f32 %v3046_v47, 0.0  ;;  %v1483_v23 = vmul.f32 1.7580993, %v2175_v18 }
 0x245   :  { %v1495_v15 = vmul.f32 1.7580993, %v2177_v0  ;;  %2184 = vpow2.f32 %v1452_v44  ;;  %v1209_v19 = vpop.f32.mrb[52].mxu0  ;;  %v1269_v20 = vpop.f32.mrb[20].mxu1  ;;  %v1391_v53 = vmin.f32 %v1205_v39, 0.0  ;;  %v1338_v7 = vmax.f32 %v3046_v47, 0.0 }
 0x246   :  { %2186 = vpow2.f32 %v1430_v46  ;;  %v1271_v61 = vpop.f32.mrb[21].mxu1  ;;  %v1211_v32 = vpop.f32.mrb[53].mxu0  ;;  %v1369_v24 = vmul.f32 1.050701, %v1337_v41  ;;  %v1454_v56 = vmul.f32 1.442695, %v1402_v11  ;;  %v3063_v28 = vadd.f32 %v1209_v19, %v2993_v3 }
 0x247   :  { %v1403_v26 = vmin.f32 %v1265_v6, 0.0  ;;  %v1527_v45 = vadd.f32 %v1495_v15, %v3030_v12  ;;  %v1432_v27 = vmul.f32 1.442695, %v1391_v53  ;;  %v1791_v29 = vadd.f32 -1.7580993, %v1526_v63 }
 0x248   :  { %v2179_v13 = vpop.eup %2178  ;;  %v1358_v31 = vmul.f32 1.050701, %v1326_v30  ;;  %2188 = vpow2.f32 %v1454_v56  ;;  %v1515_v34 = vadd.f32 %v1483_v23, %v3028_v2  ;;  %v1327_v37 = vmax.f32 %v1205_v39, 0.0 }
 0x249   :  { %v1484_v17 = vmul.f32 1.7580993, %v2179_v13  ;;  %v1456_v14 = vmul.f32 1.442695, %v1403_v26  ;;  %2190 = vpow2.f32 %v1432_v27  ;;  %v1392_v47 = vmin.f32 %v3063_v28, 0.0  ;;  %v1214_v38 = vpop.f32.mrb[54].mxu0 }
 0x24a   :  { %v2181_v9 = vpop.eup %2180  ;;  %v1274_v60 = vpop.f32.mrb[22].mxu1  ;;  %v1339_v12 = vmax.f32 %v1265_v6, 0.0  ;;  %v3068_v35 = vadd.f32 %v1269_v20, %v2970_v42  ;;  %v3071_v3 = vadd.f32 %v1214_v38, %v2995_v48  ;;  %v1792_v44 = vadd.f32 -1.7580993, %v1527_v45 }
 0x24b   :  { %v2183_v59 = vpop.eup %2182  ;;  %2192 = vpow2.f32 %v1456_v14  ;;  %v1276_v18 = vpop.f32.mrb[23].mxu1  ;;  %v1516_v2 = vadd.f32 %v1484_v17, %v3035_v22  ;;  %v1496_v46 = vmul.f32 1.7580993, %v2181_v9  ;;  %v1370_v39 = vmul.f32 1.050701, %v1338_v7 }
 0x24c   :  { %v1216_v41 = vpop.f32.mrb[55].mxu0  ;;  %v3076_v0 = vadd.f32 %v3042_v50, %v3010_v51  ;;  %v1485_v30 = vmul.f32 1.7580993, %v2183_v59  ;;  %v1434_v6 = vmul.f32 1.442695, %v1392_v47  ;;  %v1404_v63 = vmin.f32 %v3068_v35, 0.0 }
 0x24d   :  { %v1279_v42 = vpop.f32.mrb[24].mxu1  ;;  %v3079_v15 = vadd.f32 -1.7580993, %v1515_v34  ;;  %v1359_v48 = vmul.f32 1.050701, %v1327_v37  ;;  %v1393_v11 = vmin.f32 %v3071_v3, 0.0  ;;  %v3083_v19 = vadd.f32 %v1274_v60, %v2972_v54 }
 0x24e   :  { %v1281_v22 = vpop.f32.mrb[25].mxu1  ;;  %v1371_v23 = vmul.f32 1.050701, %v1339_v12  ;;  %v1328_v53 = vmax.f32 %v3063_v28, 0.0  ;;  %2194 = vpow2.f32 %v1434_v6  ;;  %v1458_v51 = vmul.f32 1.442695, %v1404_v63 }
 0x24f   :  { %v2185_v20 = vpop.eup %2184  ;;  %v3086_v61 = vadd.f32 -1.7580993, %v1516_v2  ;;  %v1528_v32 = vadd.f32 %v1496_v46, %v3050_v40  ;;  %v2019_v7 = vpack.c.bf16 %v1792_v44, %v1791_v29  ;;  %v1517_v56 = vadd.f32 %v1485_v30, %v3055_v10 }
 0x250   :  { %v2187_v50 = vpop.eup %2186  ;;  %v1497_v13 = vmul.f32 1.7580993, %v2185_v20  ;;  %2196 = vpow2.f32 %v1458_v51  ;;  %v1436_v54 = vmul.f32 1.442695, %v1393_v11  ;;  %v1405_v17 = vmin.f32 %v3083_v19, 0.0 }
 0x251   :  { %v1486_v26 = vmul.f32 1.7580993, %v2187_v50  ;;  %2020 = vmatprep.subr.bf16.mxu0 %v2019_v7  ;;  %v2021_v27 = vpack.c.bf16 %v3024_v55, %v3016_v16  ;;  %v3094_v14 = vadd.f32 %v1279_v42, %v2978_v57  ;;  %v1284_v9 = vpop.f32.mrb[26].mxu1  ;;  %v2029_v57 = vpack.c.bf16 %v3079_v15, %v3053_v52 }
 0x252   :  { %v1529_v45 = vadd.f32 %v1497_v13, %v1369_v24  ;;  %v2189_v34 = vpop.eup %2188  ;;  %2198 = vpow2.f32 %v1436_v54  ;;  %v3097_v29 = vadd.f32 %v1284_v9, %v2980_v58  ;;  %v1286_v10 = vpop.f32.mrb[27].mxu1  ;;  %v2025_v24 = vpack.c.bf16 %v3048_v33, %v3033_v49 }
 0x253   :  { %v1518_v40 = vadd.f32 %v1486_v26, %v1358_v31  ;;  %v2191_v37 = vpop.eup %2190  ;;  %v1498_v38 = vmul.f32 1.7580993, %v2189_v34  ;;  %v1460_v60 = vmul.f32 1.442695, %v1405_v17  ;;  %2022 = vmatpush3.bf16.msra.mxu0 %v2021_v27  ;;  %v1793_v55 = vadd.f32 -1.7580993, %v1528_v32 }
 0x254   :  { %v1794_v47 = vadd.f32 -1.7580993, %v1529_v45  ;;  %v1487_v59 = vmul.f32 1.7580993, %v2191_v37  ;;  %v1340_v31 = vmax.f32 %v3068_v35, 0.0  ;;  %v1406_v58 = vmin.f32 %v3094_v14, 0.0 }
 0x255   :  { %v2193_v16 = vpop.eup %2192  ;;  %v3105_v12 = vadd.f32 -1.7580993, %v1517_v56  ;;  %v1329_v49 = vmax.f32 %v3071_v3, 0.0  ;;  %2200 = vpow2.f32 %v1460_v60  ;;  %v1289_v33 = vpop.f32.mrb[28].mxu1  ;;  %v1530_v41 = vadd.f32 %v1498_v38, %v1370_v39 }
 0x256   :  { %v1499_v18 = vmul.f32 1.7580993, %v2193_v16  ;;  %v1519_v44 = vadd.f32 %v1487_v59, %v1359_v48  ;;  %v1462_v2 = vmul.f32 1.442695, %v1406_v58  ;;  %v1407_v46 = vmin.f32 %v3097_v29, 0.0  ;;  %v1291_v52 = vpop.f32.mrb[29].mxu1 }
 0x257   :  { %v3109_v30 = vadd.f32 -1.7580993, %v1518_v40  ;;  %v1341_v35 = vmax.f32 %v3083_v19, 0.0  ;;  %v2023_v63 = vpack.c.bf16 %v1794_v47, %v1793_v55  ;;  %v3115_v22 = vadd.f32 %v1289_v33, %v2986_v62 }
 0x258   :  { %v1531_v6 = vadd.f32 %v1499_v18, %v1371_v23  ;;  %v2195_v15 = vpop.eup %2194  ;;  %v3112_v11 = vadd.f32 -1.7580993, %v1519_v44  ;;  %2202 = vpow2.f32 %v1462_v2  ;;  %v1464_v3 = vmul.f32 1.442695, %v1407_v46 }
 0x259   :  { %v1294_v42 = vpop.f32.mrb[30].mxu1  ;;  %v1488_v20 = vmul.f32 1.7580993, %v2195_v15  ;;  %2024 = vmatprep.subr.bf16.mxu0 %v2023_v63  ;;  %v2033_v19 = vpack.c.bf16 %v3105_v12, %v3086_v61  ;;  %v1795_v50 = vadd.f32 -1.7580993, %v1530_v41  ;;  %v1408_v32 = vmin.f32 %v3115_v22, 0.0 }
 0x25a   :  { %v1296_v39 = vpop.f32.mrb[31].mxu1  ;;  %v1796_v48 = vadd.f32 -1.7580993, %v1531_v6  ;;  %v3118_v51 = vadd.f32 %v1294_v42, %v2991_v1  ;;  %v2197_v23 = vpop.eup %2196  ;;  %2204 = vpow2.f32 %v1464_v3  ;;  %2026 = vmatpush3.bf16.msra.mxu0 %v2025_v24  ;;  %v2037_v62 = vpack.c.bf16 %v3112_v11, %v3109_v30 }
 0x25b   :  { %v3126_v13 = vadd.f32 -1.7580993, %v3076_v0  ;;  %v1360_v7 = vmul.f32 1.050701, %v1328_v53  ;;  %v1500_v54 = vmul.f32 1.7580993, %v2197_v23 }
 0x25c   :  { %v1409_v1 = vmin.f32 %v3118_v51, 0.0  ;;  %v2199_v26 = vpop.eup %2198  ;;  %v1466_v45 = vmul.f32 1.442695, %v1408_v32  ;;  %v2027_v17 = vpack.c.bf16 %v1796_v48, %v1795_v50  ;;  %v1372_v40 = vmul.f32 1.050701, %v1340_v31 }
 0x25d   :  { %v1299_v56 = vpop.f32.mrb[32].mxu1  ;;  %v1520_v34 = vadd.f32 %v1488_v20, %v1360_v7  ;;  %v1361_v10 = vmul.f32 1.050701, %v1329_v49  ;;  %v1489_v24 = vmul.f32 1.7580993, %v2199_v26  ;;  %v1342_v38 = vmax.f32 %v3094_v14, 0.0 }
 0x25e   :  { %v3132_v27 = vadd.f32 %v1299_v56, %v2997_v4  ;;  %v1301_v9 = vpop.f32.mrb[33].mxu1  ;;  %v1373_v0 = vmul.f32 1.050701, %v1341_v35  ;;  %2206 = vpow2.f32 %v1466_v45  ;;  %v1468_v37 = vmul.f32 1.442695, %v1409_v1  ;;  %2028 = vmatprep.subr.bf16.mxu0 %v2027_v17 }
 0x25f   :  { %v2201_v53 = vpop.eup %2200  ;;  %v1521_v47 = vadd.f32 %v1489_v24, %v1361_v10  ;;  %2030 = vmatpush3.bf16.msra.mxu0 %v2029_v57  ;;  %v2045_v4 = vpack.c.bf16 %v3026_v21, %v3021_v36  ;;  %v2049_v16 = vpack.c.bf16 %v3126_v13, %v3040_v43  ;;  %v1532_v55 = vadd.f32 %v1500_v54, %v1372_v40  ;;  %v1576_v36 = vld [vmem:[%s3203_s5 + $0x10] sm:$0xff]  ;;  %v1579_v21 = vld [vmem:[%s3203_s5 + $0x28] sm:$0xff]  ;;  %v1578_v43 = vld [vmem:[%s3203_s5 + $0x20] sm:$0xff] }
 0x260   :  { %v1410_v28 = vmin.f32 %v3132_v27, 0.0  ;;  %v1501_v59 = vmul.f32 1.7580993, %v2201_v53  ;;  %2208 = vpow2.f32 %v1468_v37  ;;  %v3140_v58 = vadd.f32 -1.7580993, %v1520_v34  ;;  %v1581_v13 = vld [vmem:[%s3203_s5 + $0x38] sm:$0xff] }
 0x261   :  { %v1304_v60 = vpop.f32.mrb[34].mxu1  ;;  %v3142_v18 = vadd.f32 -1.7580993, %v1521_v47  ;;  %v1343_v49 = vmax.f32 %v3097_v29, 0.0  ;;  %v1374_v44 = vmul.f32 1.050701, %v1342_v38 }
 0x262   :  { %v1470_v31 = vmul.f32 1.442695, %v1410_v28  ;;  %v1305_v14 = vadd.f32 %v1304_v60, %v2999_v5  ;;  %v1306_v57 = vpop.f32.mrb[35].mxu1  ;;  %v2203_v33 = vpop.eup %2202  ;;  %v1533_v41 = vadd.f32 %v1501_v59, %v1373_v0  ;;  %v1797_v63 = vadd.f32 -1.7580993, %v1532_v55 }
 0x263   :  { %v1502_v2 = vmul.f32 1.7580993, %v2203_v33  ;;  %v2041_v6 = vpack.c.bf16 %v3142_v18, %v3140_v58  ;;  %v1344_v15 = vmax.f32 %v3115_v22, 0.0  ;;  %v1375_v39 = vmul.f32 1.050701, %v1343_v49 }
 0x264   :  { %2210 = vpow2.f32 %v1470_v31  ;;  %v1411_v46 = vmin.f32 %v1305_v14, 0.0  ;;  %v2205_v35 = vpop.eup %2204  ;;  %v1798_v42 = vadd.f32 -1.7580993, %v1533_v41  ;;  %v1345_v7 = vmax.f32 %v3118_v51, 0.0 }
 0x265   :  { %v1309_v52 = vpop.f32.mrb[36].mxu1  ;;  %v1534_v5 = vadd.f32 %v1502_v2, %v1374_v44  ;;  %v1503_v48 = vmul.f32 1.7580993, %v2205_v35  ;;  %v1376_v26 = vmul.f32 1.050701, %v1344_v15  ;;  %v1346_v28 = vmax.f32 %v3132_v27, 0.0 }
 0x266   :  { %v1310_v29 = vadd.f32 %v1309_v52, %v3001_v8  ;;  %v1311_v3 = vpop.f32.mrb[37].mxu1  ;;  %v1472_v20 = vmul.f32 1.442695, %v1411_v46  ;;  %v2031_v23 = vpack.c.bf16 %v1798_v42, %v1797_v63  ;;  %v1377_v10 = vmul.f32 1.050701, %v1345_v7  ;;  %v1577_v15 = vld [vmem:[%s3203_s5 + $0x18] sm:$0xff] }
 0x267   :  { %v1535_v32 = vadd.f32 %v1503_v48, %v1375_v39  ;;  %v1799_v8 = vadd.f32 -1.7580993, %v1534_v5  ;;  %v1347_v38 = vmax.f32 %v1305_v14, 0.0  ;;  %v1589_v5 = vpop.permute.xlu0 %1588 }
 0x268   :  { %v1412_v50 = vmin.f32 %v1310_v29, 0.0  ;;  %2212 = vpow2.f32 %v1472_v20  ;;  %v2207_v56 = vpop.eup %2206  ;;  %2032 = vmatprep.subr.bf16.mxu0 %v2031_v23  ;;  %v1348_v18 = vmax.f32 %v1310_v29, 0.0 }
 0x269   :  { %v1314_v1 = vpop.f32.mrb[38].mxu1  ;;  %v1800_v17 = vadd.f32 -1.7580993, %v1535_v32  ;;  %v1504_v9 = vmul.f32 1.7580993, %v2207_v56  ;;  %2034 = vmatpush3.bf16.msra.mxu0 %v2033_v19 }
 0x26a   :  { %v1474_v54 = vmul.f32 1.442695, %v1412_v50  ;;  %v1315_v22 = vadd.f32 %v1314_v1, %v3003_v25  ;;  %v1316_v45 = vpop.f32.mrb[39].mxu1  ;;  %v2209_v34 = vpop.eup %2208  ;;  %v1378_v19 = vmul.f32 1.050701, %v1346_v28 }
 0x26b   :  { %v1536_v51 = vadd.f32 %v1504_v9, %v1376_v26  ;;  %v1505_v24 = vmul.f32 1.7580993, %v2209_v34  ;;  %v2035_v0 = vpack.c.bf16 %v1800_v17, %v1799_v8  ;;  %v1379_v31 = vmul.f32 1.050701, %v1347_v38  ;;  %v1594_v50 = vpop.permute.xlu1 %1593  ;;  %v1599_v26 = vpop.permute.xlu0 %1598 }
 0x26c   :  { %2214 = vpow2.f32 %v1474_v54  ;;  %v1413_v40 = vmin.f32 %v1315_v22, 0.0  ;;  %v1349_v14 = vmax.f32 %v1315_v22, 0.0  ;;  %v1380_v44 = vmul.f32 1.050701, %v1348_v18 }
 0x26d   :  { %v1537_v25 = vadd.f32 %v1505_v24, %v1377_v10  ;;  %2036 = vmatprep.subr.bf16.mxu0 %v2035_v0  ;;  %v1801_v61 = vadd.f32 -1.7580993, %v1536_v51 }
 0x26e   :  { %v2211_v37 = vpop.eup %2210  ;;  %v1476_v53 = vmul.f32 1.442695, %v1413_v40  ;;  %2038 = vmatpush3.bf16.msra.mxu0 %v2037_v62  ;;  %v1381_v2 = vmul.f32 1.050701, %v1349_v14 }
 0x26f   :  { %v1506_v47 = vmul.f32 1.7580993, %v2211_v37  ;;  %v1802_v12 = vadd.f32 -1.7580993, %v1537_v25  ;;  %v1604_v17 = vpop.permute.xlu1 %1603 }
 0x270   :  { %2216 = vpow2.f32 %v1476_v53 }
 0x271   :  { %v2039_v55 = vpack.c.bf16 %v1802_v12, %v1801_v61  ;;  %v1538_v59 = vadd.f32 %v1506_v47, %v1378_v19 }
 0x272   :  { %v2213_v60 = vpop.eup %2212 }
 0x273   :  { %v1507_v58 = vmul.f32 1.7580993, %v2213_v60  ;;  %2040 = vmatprep.subr.bf16.mxu0 %v2039_v55  ;;  %v1803_v33 = vadd.f32 -1.7580993, %v1538_v59 }
 0x274   :  { %2042 = vmatpush3.bf16.msra.mxu0 %v2041_v6  ;;  %v1574_v6 = vld [vmem:[%s3203_s5] sm:$0xff] }
 0x275   :  { %v1539_v49 = vadd.f32 %v1507_v58, %v1379_v31 }
 0x276   :  { %v2215_v27 = vpop.eup %2214 }
 0x277   :  { %v1508_v57 = vmul.f32 1.7580993, %v2215_v27  ;;  %v1804_v41 = vadd.f32 -1.7580993, %v1539_v49 }
 0x279   :  { %v2043_v11 = vpack.c.bf16 %v1804_v41, %v1803_v33  ;;  %v1540_v62 = vadd.f32 %v1508_v57, %v1380_v44 }
 0x27a   :  { %v2217_v30 = vpop.eup %2216 }
 0x27b   :  { %v1509_v46 = vmul.f32 1.7580993, %v2217_v30  ;;  %2044 = vmatprep.subr.bf16.mxu0 %v2043_v11  ;;  %v1805_v35 = vadd.f32 -1.7580993, %v1540_v62 }
 0x27c   :  { %2046 = vmatpush3.bf16.msra.mxu0 %v2045_v4  ;;  %v1580_v4 = vld [vmem:[%s3203_s5 + $0x30] sm:$0xff]  ;;  %s2244_s5 = smov [#allocation2]  }
 0x27d   :  { %v1541_v52 = vadd.f32 %v1509_v46, %v1381_v2  ;;  %s1700_s21 = sshll.u32 %s2244_s5, 4  ;;  %s1701_s21 = int_to_ptr.vmem [resolvable:$true] %s1700_s21 }
 0x27e   :  { %s2218_s6 = scalar_lea.vmem %s1701_s21, 512  ;;  %p2223_p1 = scmp.lt.s32.totalorder %s1701_s21, %s1701_s21 }
 0x27f   :  { %v1806_v63 = vadd.f32 -1.7580993, %v1541_v52  ;;  %p2219_p0 = scmp.ne.s32.totalorder %s1701_s21, %s2218_s6  ;;  %p2224_p2 = scmp.lt.s32.totalorder %s2218_s6, %s2218_s6 }
 0x281   :  { %v2047_v42 = vpack.c.bf16 %v1806_v63, %v1805_v35  ;;  %p2225_p3 = por %p2224_p2, %p2223_p1 }
 0x283   :  { %2048 = vmatprep.subr.bf16.mxu0 %v2047_v42  ;;  %p2226_p4 = pnand %p2225_p3, %p2219_p0 }
 0x284   :  { %2050 = vmatpush3.bf16.msra.mxu0 %v2049_v16 }
 0x287   :  { %1671 = vmatmul.mubr.f32.vlgmr.msra.gmra.mrb[56].mxu0 %v1574_v6 }
 0x288   :  { %1675 = vmatprep.mubr.f32.mxu0 %v1577_v15 }
 0x28b   :  { %1676 = vmatmul.mubr.f32.gmra.mrb[58].mxu0 %v1576_v36 }
 0x28c   :  { %1680 = vmatprep.mubr.f32.mxu0 %v1579_v21 }
 0x28f   :  { %1681 = vmatmul.mubr.f32.gmra.mrb[60].mxu0 %v1578_v43 }
 0x290   :  { %1685 = vmatprep.mubr.f32.mxu0 %v1581_v13 }
 0x293   :  { %1686 = vmatmul.mubr.f32.gmra.mrb[62].mxu0 %v1580_v4 }
 0x35a   :  { %v1879_v16 = vpop.f32.mrb[56].mxu0 }
 0x35b   :  { %v1880_v29 = vpop.f32.mrb[57].mxu0 }
 0x35c   :  { %v1881_v3 = vadd.f32 %v1880_v29, %v1879_v16 }
 0x35e   :  { %v1673_v39 = vadd.f32 %v1881_v3, %v1589_v5  ;;  %v1882_v48 = vpop.f32.mrb[58].mxu0 }
 0x35f   :  { %v1883_v20 = vpop.f32.mrb[59].mxu0 }
 0x360   :  { %1691 = vst [vmem:[#allocation2] sm:$0xff] %v1673_v39  ;;  %v1884_v23 = vadd.f32 %v1883_v20, %v1882_v48 }
 0x362   :  { %v1678_v32 = vadd.f32 %v1884_v23, %v1594_v50  ;;  %v1885_v7 = vpop.f32.mrb[60].mxu0 }
 0x363   :  { %v1886_v1 = vpop.f32.mrb[61].mxu0 }
 0x364   :  { %1692 = vst [vmem:[#allocation2 + $0x8] sm:$0xff] %v1678_v32  ;;  %v1887_v56 = vadd.f32 %v1886_v1, %v1885_v7 }
 0x366   :  { %v1683_v54 = vadd.f32 %v1887_v56, %v1599_v26  ;;  %v1888_v22 = vpop.f32.mrb[62].mxu0 }
 0x367   :  { %v1889_v45 = vpop.f32.mrb[63].mxu0 }
 0x368   :  { %1693 = vst [vmem:[#allocation2 + $0x10] sm:$0xff] %v1683_v54  ;;  %v1890_v8 = vadd.f32 %v1889_v45, %v1888_v22 }
 0x36a   :  { %v1688_v9 = vadd.f32 %v1890_v8, %v1604_v17 }
 0x36c   :  { %1694 = vst [vmem:[#allocation2 + $0x18] sm:$0xff] %v1688_v9 }
 0x36d   :  { %2229 = shalt.err (!%p2226_p4)
}
 0x36e   :  { %s2230_s23 = scalar_lea.hbm %s3205_s7, 512 }
 0x36f   :  { %p2231_p5 = scmp.ne.s32.totalorder %s3205_s7, %s2230_s23  ;;  %p2234_p6 = scmp.lt.u32.totalorder %s2230_s23, %s3205_s7 }
 0x371   :  { %p2236_p7 = pnand %p2234_p6, %p2231_p5 }
 0x373   :  { %2239 = shalt.err (!%p2236_p7)
}
 0x374   :  { %s2245_s28 = smov 128   ;;  %s2246_s29 = smov 8  }
 0x375   :  { %1706 = dma.vmem_to_hbm [thread:$0]  %s1701_s21, 512, %s3205_s7, [#allocation3], %s2245_s28, %s2245_s28, %s2246_s29  }
 0x376   :  { %2240 = dma.done.wait [#allocation3], 512  }
 0x377   :  { %2241 = vsyncadd [#allocation3], 4294966784 }
 0x378   :  { %1710 = vsyncpa [#allocation3], 1 }

</bundles_post_ra>
